<compile_context>
chip_gen: v5e
topology: v5e:2x2
jax: 0.10.0
libtpu: 0.0.40
codegen_flags: <defaults>
</compile_context>

<pallas_src>
import functools
import math

import jax
import jax.numpy as jnp
from jax.experimental import pallas as pl
from jax.experimental.pallas import tpu as pltpu

_BN_EPS = 1e-5
_BN_SCALE = 1.0 / math.sqrt(1.0 + _BN_EPS)


def _round_up(x, m):
    return ((x + m - 1) // m) * m


# ----------------------------------------------------------------------------
# Pallas kernel: tiled matmul (bf16 x bf16 -> f32 acc) with fused scale/offset/ReLU
# ----------------------------------------------------------------------------
def _matmul_kernel(a_ref, b_ref, scale_ref, offset_ref, o_ref, acc_ref, *, relu):
    k = pl.program_id(2)

    @pl.when(k == 0)
    def _zero():
        acc_ref[...] = jnp.zeros_like(acc_ref)

    acc_ref[...] += jnp.dot(a_ref[...], b_ref[...],
                            preferred_element_type=jnp.float32)

    @pl.when(k == pl.num_programs(2) - 1)
    def _store():
        y = acc_ref[...] * scale_ref[...] + offset_ref[...]
        if relu:
            y = jnp.maximum(y, 0.0)
        o_ref[...] = y.astype(o_ref.dtype)


def _choose_k_tiling(K):
    """Largest tk in {2048..128} whose padding waste on K is small."""
    for tk in (2048, 1024, 512, 256, 128):
        Kp = _round_up(K, tk)
        if Kp - K <= max(256, K // 8):
            return Kp, tk
    return _round_up(K, 128), 128


def prep_matmul(w2, bias, *, bn=True, relu=True):
    """Precompute padded bf16 weight and fused BN epilogue for `y = relu?(x@W*scale+offset)`.

    w2: [K, N] f32 weight; bias: [N].
    BN(eval, fresh stats): scale = gamma/sqrt(var+eps) = 1/sqrt(1+eps);
                           offset = (bias - mean)*scale + beta = bias*scale.
    """
    K, N = w2.shape
    Kp, tk = _choose_k_tiling(K)
    Np = _round_up(N, 128)
    tn = 256 if (Np % 256 == 0) else 128

    if bn:
        scale = jnp.full((N,), _BN_SCALE, jnp.float32)
        offset = bias.astype(jnp.float32) * _BN_SCALE
    else:
        scale = jnp.ones((N,), jnp.float32)
        offset = bias.astype(jnp.float32)

    w_p = jnp.zeros((Kp, Np), jnp.bfloat16).at[:K, :N].set(w2.astype(jnp.bfloat16))
    s_p = jnp.ones((1, Np), jnp.float32).at[:, :N].set(scale[None, :])
    o_p = jnp.zeros((1, Np), jnp.float32).at[:, :N].set(offset[None, :])
    return dict(w=w_p, scale=s_p, offset=o_p,
                K=K, N=N, Kp=Kp, Np=Np, tk=tk, tn=tn, relu=relu)


def matmul_prepared(a, prep):
    """out[:M,:N] = maybe_relu((a @ W) * scale + offset) via the Pallas MXU kernel."""
    M, K = a.shape
    assert K == prep["K"], (K, prep["K"])
    Kp, Np, tk, tn = prep["Kp"], prep["Np"], prep["tk"], prep["tn"]

    if M <= 256:
        Mp, tm = _round_up(M, 16), _round_up(M, 16)   # single i-block covering all of M
    else:
        Mp, tm = _round_up(M, 256), 256               # 256-row blocks (>=2 parallel i-blocks)

    a = a.astype(jnp.bfloat16)
    if (Mp, Kp) != (M, K):
        a = jnp.zeros((Mp, Kp), jnp.bfloat16).at[:M, :K].set(a)

    grid = (Mp // tm, Np // tn, Kp // tk)
    out = pl.pallas_call(
        functools.partial(_matmul_kernel, relu=prep["relu"]),
        out_shape=jax.ShapeDtypeStruct((Mp, Np), jnp.float32),
        grid_spec=pltpu.PrefetchScalarGridSpec(
            num_scalar_prefetch=0,
            grid=grid,
            in_specs=[
                pl.BlockSpec((tm, tk), lambda i, j, k: (i, k)),
                pl.BlockSpec((tk, tn), lambda i, j, k: (k, j)),
                pl.BlockSpec((1, tn), lambda i, j, k: (0, j)),
                pl.BlockSpec((1, tn), lambda i, j, k: (0, j)),
            ],
            out_specs=pl.BlockSpec((tm, tn), lambda i, j, k: (i, j)),
            scratch_shapes=[pltpu.VMEM((tm, tn), jnp.float32)],
        ),
        compiler_params=pltpu.CompilerParams(
            dimension_semantics=("parallel", "parallel", "arbitrary")),
    )(a, prep["w"], prep["scale"], prep["offset"])

    if (Mp, Np) != (M, prep["N"]):
        out = out[:M, :prep["N"]]
    return out


# ----------------------------------------------------------------------------
# Convolution = (materialized) im2col + Pallas fused matmul
# ----------------------------------------------------------------------------
def _extract_patches(x, k, dilation, padding):
    """x: [B,H,W,C] -> [B*H*W, k*k*C]; stride 1, 2*padding == dilation*(k-1)."""
    B, H, W, C = x.shape
    if k == 1:
        return x.reshape(B * H * W, C)
    # TODO(synk): implicit im2col (streaming the k*k taps from HBM inside the kernel) would
    # avoid this k^2 activation inflation at realistic resolutions.
    xp = jnp.pad(x, ((0, 0), (padding, padding), (padding, padding), (0, 0)))
    cols = []
    for ky in range(k):
        for kx in range(k):
            cols.append(xp[:, ky * dilation:ky * dilation + H,
                           kx * dilation:kx * dilation + W, :])
    return jnp.concatenate(cols, axis=-1).reshape(B * H * W, k * k * C)


def conv_apply(x, prep, *, ksize, dilation=1, padding=0):
    B, H, W, _ = x.shape
    patches = _extract_patches(x, ksize, dilation, padding)
    out = matmul_prepared(patches, prep)
    return out.reshape(B, H, W, prep["N"])


# ----------------------------------------------------------------------------
# Bilinear upsampling with align_corners=True (glue; not the hot path)
# ----------------------------------------------------------------------------
def upsample_bilinear_align_corners(x, out_h, out_w):
    B, H, W, C = x.shape
    if H == 1 and W == 1:
        return jnp.broadcast_to(x, (B, out_h, out_w, C))

    def idx(in_s, out_s):
        src = jnp.arange(out_s, dtype=jnp.float32) * ((in_s - 1) / (out_s - 1))
        i0 = jnp.clip(jnp.floor(src).astype(jnp.int32), 0, in_s - 1)
        i1 = jnp.clip(i0 + 1, 0, in_s - 1)
        frac = src - i0.astype(jnp.float32)
        return i0, i1, frac

    h0, h1, hf = idx(H, out_h)
    w0, w1, wf = idx(W, out_w)
    top = x[:, h0, :, :]
    bot = x[:, h1, :, :]
    rows = top * (1.0 - hf)[None, :, None, None] + bot * hf[None, :, None, None]
    left = rows[:, :, w0, :]
    right = rows[:, :, w1, :]
    return left * (1.0 - wf)[None, None, :, None] + right * wf[None, None, :, None]


# ----------------------------------------------------------------------------
# Parameters (deterministic synthetic init matching the module's shapes)
# ----------------------------------------------------------------------------
def _kaiming_conv(key, k, cin, cout):
    fan_out = cout * k * k
    std = (2.0 / fan_out) ** 0.5
    return std * jax.random.normal(key, (k, k, cin, cout), jnp.float32)


def _conv_bias(key, k, cin, cout):
    fan_in = cin * k * k
    bound = 1.0 / (fan_in ** 0.5)
    return jax.random.uniform(key, (cout,), jnp.float32, minval=-bound, maxval=bound)


def init_params(key, num_classes, dim_in=2048, dim_out=256, low_ch=256):
    keys = iter(jax.random.split(key, 40))

    def conv(k, cin, cout):
        return dict(w=_kaiming_conv(next(keys), k, cin, cout),
                    b=_conv_bias(next(keys), k, cin, cout))

    p = {}
    p["b1"] = conv(1, dim_in, dim_out)          # ASPP branch1 (1x1)
    p["b2"] = conv(3, dim_in, dim_out)          # ASPP branch2 (3x3, dil 6)
    p["b3"] = conv(3, dim_in, dim_out)          # ASPP branch3 (3x3, dil 12)
    p["b4"] = conv(3, dim_in, dim_out)          # ASPP branch4 (3x3, dil 18)
    p["b5"] = conv(1, dim_in, dim_out)          # ASPP global branch (1x1)
    p["cat"] = conv(1, dim_out * 5, dim_out)    # ASPP conv_cat (1x1)
    p["shortcut"] = conv(1, low_ch, 48)         # shortcut_conv (1x1)
    p["catconv1"] = conv(3, dim_out + 48, dim_out)
    p["catconv2"] = conv(3, dim_out, dim_out)
    p["cls"] = conv(1, dim_out, num_classes)
    return p


def prepare_model(params, deep_hw, OS=16):
    """One-time preprocessing: padded bf16 weights + fused BN epilogues + ASPP specialization."""
    rate = 16 // OS
    h, w = deep_hw
    prep = {}

    def w2(p, center_only=False):
        W = p["w"]
        k = W.shape[0]
        if center_only:
            return W[k // 2, k // 2]               # [cin, cout] — center tap only
        return W.reshape(k * k * W.shape[2], W.shape[3])

    dils = {"b2": 6 * rate, "b3": 12 * rate, "b4": 18 * rate}
    # Exact specialization: with dilation >= H and >= W every off-center tap of the dilated
    # 3x3 kernels only ever multiplies zero padding, so the branch equals a 1x1 conv.
    degen = all(d >= h and d >= w for d in dils.values())
    prep["aspp_degenerate"] = degen

    if degen:
        ws = [w2(params["b1"]), w2(params["b2"], True),
              w2(params["b3"], True), w2(params["b4"], True)]
        bs = [params[n]["b"] for n in ("b1", "b2", "b3", "b4")]
        prep["b1234"] = prep_matmul(jnp.concatenate(ws, axis=1),
                                    jnp.concatenate(bs, axis=0), bn=True, relu=True)
    else:
        for n in ("b1", "b2", "b3", "b4"):
            prep[n] = prep_matmul(w2(params[n]), params[n]["b"], bn=True, relu=True)

    prep["b5"] = prep_matmul(w2(params["b5"]), params["b5"]["b"], bn=True, relu=True)
    prep["cat"] = prep_matmul(w2(params["cat"]), params["cat"]["b"], bn=True, relu=True)
    prep["shortcut"] = prep_matmul(w2(params["shortcut"]), params["shortcut"]["b"],
                                   bn=True, relu=True)
    prep["catconv1"] = prep_matmul(w2(params["catconv1"]), params["catconv1"]["b"],
                                   bn=True, relu=True)
    prep["catconv2"] = prep_matmul(w2(params["catconv2"]), params["catconv2"]["b"],
                                   bn=True, relu=True)
    prep["cls"] = prep_matmul(w2(params["cls"]), params["cls"]["b"], bn=False, relu=False)
    return prep


# ----------------------------------------------------------------------------
# Forward pass (ASPP + decoder head)
# ----------------------------------------------------------------------------
def deeplabv3plus_forward(prep, low_feat, deep_feat, OS=16):
    """low_feat: [B,H4,W4,256] (layers[0]); deep_feat: [B,H16,W16,2048] (layers[-1])."""
    rate = 16 // OS
    x = deep_feat
    B, h, w, Cin = x.shape
    M = B * h * w
    dim_out = 256

    # --- ASPP ---
    if prep["aspp_degenerate"]:
        # b1..b4 fused into a single [M,2048] @ [2048,1024] matmul (exact at this size)
        branches = matmul_prepared(x.reshape(M, Cin), prep["b1234"])          # [M, 1024]
    else:
        c1 = conv_apply(x, prep["b1"], ksize=1)
        c2 = conv_apply(x, prep["b2"], ksize=3, dilation=6 * rate, padding=6 * rate)
        c3 = conv_apply(x, prep["b3"], ksize=3, dilation=12 * rate, padding=12 * rate)
        c4 = conv_apply(x, prep["b4"], ksize=3, dilation=18 * rate, padding=18 * rate)
        branches = jnp.concatenate([c1, c2, c3, c4], axis=-1).reshape(M, 4 * dim_out)

    gf = jnp.mean(x, axis=(1, 2))                                             # [B, Cin]
    gf = matmul_prepared(gf, prep["b5"])                                      # [B, 256]
    gf_full = jnp.broadcast_to(gf[:, None, :], (B, h * w, dim_out)).reshape(M, dim_out)

    feat = jnp.concatenate([branches, gf_full], axis=-1)                      # [M, 1280]
    aspp = matmul_prepared(feat, prep["cat"]).reshape(B, h, w, dim_out)

    # dropout1: eval-mode identity
    aspp = upsample_bilinear_align_corners(aspp, h * (OS // 4), w * (OS // 4))

    # --- decoder ---
    sc = conv_apply(low_feat, prep["shortcut"], ksize=1)
    cat = jnp.concatenate([aspp, sc], axis=-1)
    y = conv_apply(cat, prep["catconv1"], ksize=3, dilation=1, padding=1)
    y = conv_apply(y, prep["catconv2"], ksize=3, dilation=1, padding=1)
    y = conv_apply(y, prep["cls"], ksize=1)                                   # no BN / ReLU
    y = upsample_bilinear_align_corners(y, y.shape[1] * 4, y.shape[2] * 4)

    return jnp.transpose(y, (0, 3, 1, 2))  # back to NCHW like the PyTorch module


if __name__ == "__main__":
    key = jax.random.PRNGKey(0)
    k_low, k_deep, k_params = jax.random.split(key, 3)

    num_classes = 8
    B, OS = 2, 16
    # Backbone features consistent with a [B, 3, 64, 64] input image:
    low_feat = jax.random.normal(k_low, (B, 16, 16, 256), jnp.float32)    # layers[0], stride 4
    deep_feat = jax.random.normal(k_deep, (B, 4, 4, 2048), jnp.float32)   # layers[-1], stride 16

    params = init_params(k_params, num_classes)
    prep = prepare_model(params, deep_hw=(deep_feat.shape[1], deep_feat.shape[2]), OS=OS)

    out = deeplabv3plus_forward(prep, low_feat, deep_feat, OS=OS)
    out = jax.block_until_ready(out)
    assert out.shape == (B, num_classes, 64, 64), out.shape
    assert bool(jnp.all(jnp.isfinite(out)))
    print("KERNEL_OK")
</pallas_src>

<mosaic_0001>
module attributes {stable_mosaic.version = 11 : i64} {
  func.func @_matmul_kernel(%arg0: i32, %arg1: i32, %arg2: i32, %arg3: memref<32x2048xbf16, #tpu.memory_space<vmem>>, %arg4: memref<2048x256xbf16, #tpu.memory_space<vmem>>, %arg5: memref<1x256xf32, #tpu.memory_space<vmem>>, %arg6: memref<1x256xf32, #tpu.memory_space<vmem>>, %arg7: memref<32x256xf32, #tpu.memory_space<vmem>>, %arg8: memref<32x256xf32, #tpu.memory_space<vmem>>) attributes {dimension_semantics = [#tpu.dimension_semantics<parallel>, #tpu.dimension_semantics<parallel>, #tpu.dimension_semantics<arbitrary>], iteration_bounds = array<i64: 1, 4, 1>, scalar_prefetch = 0 : i64, scratch_operands = 1 : i64, tpu.core_type = #tpu.core_type<tc>, window_params = [{transform_indices = @transform_0, window_bounds = array<i64: 32, 2048>}, {transform_indices = @transform_1, window_bounds = array<i64: 2048, 256>}, {transform_indices = @transform_2, window_bounds = array<i64: 1, 256>}, {transform_indices = @transform_3, window_bounds = array<i64: 1, 256>}, {transform_indices = @transform_4, window_bounds = array<i64: 32, 256>}]} {
    %c0_i32 = arith.constant 0 : i32
    %0 = arith.cmpi eq, %arg2, %c0_i32 : i32
    %1 = arith.extui %0 : i1 to i32
    %c0_i32_0 = arith.constant 0 : i32
    %2 = arith.cmpi ne, %1, %c0_i32_0 : i32
    scf.if %2 {
      %cst_10 = arith.constant 0.000000e+00 : f32
      %12 = vector.broadcast %cst_10 : f32 to vector<32x256xf32>
      %c0_11 = arith.constant 0 : index
      %c0_12 = arith.constant 0 : index
      %13 = vector.load %arg8[%c0_11, %c0_12] : memref<32x256xf32, #tpu.memory_space<vmem>>, vector<32x256xf32>
      tpu.vector_store %arg8[%c0_11, %c0_12], %12 {strides = array<i32>} : memref<32x256xf32, #tpu.memory_space<vmem>>, vector<32x256xf32>,
    } else {
    }
    %c0 = arith.constant 0 : index
    %c0_1 = arith.constant 0 : index
    %3 = vector.load %arg8[%c0, %c0_1] : memref<32x256xf32, #tpu.memory_space<vmem>>, vector<32x256xf32>
    %c0_2 = arith.constant 0 : index
    %c0_3 = arith.constant 0 : index
    %4 = vector.load %arg3[%c0_2, %c0_3] : memref<32x2048xbf16, #tpu.memory_space<vmem>>, vector<32x2048xbf16>
    %c0_4 = arith.constant 0 : index
    %c0_5 = arith.constant 0 : index
    %5 = vector.load %arg4[%c0_4, %c0_5] : memref<2048x256xbf16, #tpu.memory_space<vmem>>, vector<2048x256xbf16>
    %cst = arith.constant dense<0.000000e+00> : vector<32x256xf32>
    %6 = tpu.matmul %4, %5, %cst {dimension_numbers = #tpu.dot_dimension_numbers<[1], [0], [0], [1], [0, 0, 1, 1], [], []>} : vector<32x2048xbf16>, vector<2048x256xbf16>, vector<32x256xf32> -> vector<32x256xf32>
    %7 = arith.addf %3, %6 : vector<32x256xf32>
    %c0_6 = arith.constant 0 : index
    %c0_7 = arith.constant 0 : index
    %8 = vector.load %arg8[%c0_6, %c0_7] : memref<32x256xf32, #tpu.memory_space<vmem>>, vector<32x256xf32>
    tpu.vector_store %arg8[%c0_6, %c0_7], %7 {strides = array<i32>} : memref<32x256xf32, #tpu.memory_space<vmem>>, vector<32x256xf32>,
    %c0_i32_8 = arith.constant 0 : i32
    %9 = arith.cmpi eq, %arg2, %c0_i32_8 : i32
    %10 = arith.extui %9 : i1 to i32
    %c0_i32_9 = arith.constant 0 : i32
    %11 = arith.cmpi ne, %10, %c0_i32_9 : i32
    scf.if %11 {
      %c0_10 = arith.constant 0 : index
      %c0_11 = arith.constant 0 : index
      %12 = vector.load %arg8[%c0_10, %c0_11] : memref<32x256xf32, #tpu.memory_space<vmem>>, vector<32x256xf32>
      %c0_12 = arith.constant 0 : index
      %c0_13 = arith.constant 0 : index
      %13 = vector.load %arg5[%c0_12, %c0_13] : memref<1x256xf32, #tpu.memory_space<vmem>>, vector<1x256xf32>
      %14 = vector.broadcast %13 : vector<1x256xf32> to vector<32x256xf32>
      %15 = arith.mulf %12, %14 : vector<32x256xf32>
      %c0_14 = arith.constant 0 : index
      %c0_15 = arith.constant 0 : index
      %16 = vector.load %arg6[%c0_14, %c0_15] : memref<1x256xf32, #tpu.memory_space<vmem>>, vector<1x256xf32>
      %17 = vector.broadcast %16 : vector<1x256xf32> to vector<32x256xf32>
      %18 = arith.addf %15, %17 : vector<32x256xf32>
      %cst_16 = arith.constant 0.000000e+00 : f32
      %19 = vector.broadcast %cst_16 : f32 to vector<32x256xf32>
      %20 = arith.maximumf %18, %19 : vector<32x256xf32>
      %c0_17 = arith.constant 0 : index
      %c0_18 = arith.constant 0 : index
      %21 = vector.load %arg7[%c0_17, %c0_18] : memref<32x256xf32, #tpu.memory_space<vmem>>, vector<32x256xf32>
      tpu.vector_store %arg7[%c0_17, %c0_18], %20 {strides = array<i32>} : memref<32x256xf32, #tpu.memory_space<vmem>>, vector<32x256xf32>,
    } else {
    }
    return
  }
  func.func @transform_0(%arg0: i32, %arg1: i32, %arg2: i32) -> (i32, i32) {
    %c0_i32 = arith.constant 0 : i32
    return %arg0, %arg2 : i32, i32
  }
  func.func @transform_1(%arg0: i32, %arg1: i32, %arg2: i32) -> (i32, i32) {
    %c0_i32 = arith.constant 0 : i32
    return %arg2, %arg1 : i32, i32
  }
  func.func @transform_2(%arg0: i32, %arg1: i32, %arg2: i32) -> (i32, i32) {
    %c0_i32 = arith.constant 0 : i32
    %c0_i32_0 = arith.constant 0 : i32
    return %c0_i32, %arg1 : i32, i32
  }
  func.func @transform_3(%arg0: i32, %arg1: i32, %arg2: i32) -> (i32, i32) {
    %c0_i32 = arith.constant 0 : i32
    %c0_i32_0 = arith.constant 0 : i32
    return %c0_i32, %arg1 : i32, i32
  }
  func.func @transform_4(%arg0: i32, %arg1: i32, %arg2: i32) -> (i32, i32) {
    %c0_i32 = arith.constant 0 : i32
    return %arg0, %arg1 : i32, i32
  }
}

</mosaic_0001>

<bundles_post_ra>
// kernel: tpu_custom_call.1
= control target key start
LH: loop header
LB: loop body
LE: loop exit
PB: predicated region body
PF: predicated region fallthrough
CT: control target
= control target key end

     0   :  { %s5695_s0 = inlined_call_operand.hbm [shape: bf16[32,2048], index: 0, kind: input, shape index: {}]   ;;  %s5696_s1 = inlined_call_operand.hbm [shape: bf16[2048,1024], index: 1, kind: input, shape index: {}]   ;;  %s5697_s2 = inlined_call_operand.hbm [shape: f32[1,1024], index: 2, kind: input, shape index: {}]   ;;  %s5698_s3 = inlined_call_operand.hbm [shape: f32[1,1024], index: 3, kind: input, shape index: {}]   ;;  %s5699_s4 = inlined_call_operand.hbm [shape: f32[32,1024], index: 4, kind: output, shape index: {}]  }
   0x1   :  { %5704 = sst [smem:[#allocation21_spill]] %s5695_s0 }
   0x2   :  { %5705 = sst [smem:[#allocation22_spill]] %s5696_s1 }
   0x3   :  { %9 = vsyncpa [#allocation4], 0 }
   0x4   :  { %10 = vsyncpa [#allocation7], 0 }
   0x5   :  { %12 = vsyncpa [#allocation7 + $0x1], 0 }
   0x6   :  { %13 = vsyncpa [#allocation10], 0 }
   0x7   :  { %15 = vsyncpa [#allocation10 + $0x1], 0 }
   0x8   :  { %16 = vsyncpa [#allocation5], 0 }
   0x9   :  { %18 = vsyncpa [#allocation5 + $0x1], 0  ;;  %s4755_s15 = smov 0   ;;  %s4757_s16 = smov 0  }
   0xa   :  { %s4759_s17 = smov 0   ;;  %s4761_s18 = smov 0  }
   0xb   :  { %s4763_s19 = smov 0   ;;  %s4765_s20 = smov 0  }
   0xc LB: > { %5706 = sst [smem:[#allocation16_spill]] %s4707_s17  ;;  %s39_s21 = sadd.s32 1, %s4715_s19  ;;  %s4719_s20 = sphi %s4765_s20, %s24_s20   ;;  %s4715_s19 = sphi %s4763_s19, %s5723_s19   ;;  %s4711_s18 = sphi %s4761_s18, %s5722_s18   ;;  %s4707_s17 = sphi %s4759_s17, %s5721_s17   ;;  %s4703_s16 = sphi %s4757_s16, %s5725_s16   ;;  %s4699_s15 = sphi %s4755_s15, %s5724_s15  }
   0xd   : > { %5707 = sst [smem:[#allocation17_spill]] %s4715_s19  ;;  %s80_s22 = sadd.s32 1, %s4707_s17 }
   0xe   : > { %p41_p0 = scmp.ge.s32.totalorder %s39_s21, 4  ;;  %p87_p1 = scmp.ne.s32.totalorder %s4707_s17, %s4703_s16 }
   0xf   : > { %p88_p2 = scmp.eq.s32.totalorder %s4719_s20, 0  ;;  %p4449_p4 = scmp.lt.s32.totalorder %s4719_s20, 4 }
  0x10   : > { %s5727_s21 = smov (%p41_p0, %s39_s21), 0  ;;  %s217_s25 = sand.u32 1, %s4719_s20  }
  0x11   : > { %5708 = sst [smem:[#allocation18_spill]] %s5727_s21  ;;  %p4795_p3 = por %p88_p2, %p87_p1 }
  0x12   : > { %s76_s24 = ssub.s32 %s4715_s19, %s5727_s21  ;;  %s4804_s26 = sand.u32 1, %s4707_s17  }
  0x13   : > { %p78_p5 = scmp.eq.s32.totalorder %s76_s24, 0  ;;  %s4128_s27 = sshll.u32 %s4715_s19, 3 }
  0x14   : > { %s2958_s29 = sshll.u32 %s4804_s26, 11  ;;  %s5711_s1 = sld [smem:[#allocation22_spill]] }
  0x15   : > { %s4808_s28 = scalar_select %p78_p5, %s4707_s17, %s80_s22  }
  0x16   : > { %s221_s8 = scalar_lea.vmem [#allocation6], %s2958_s29  ;;  %p4818_p6 = pnand %p4449_p4, %p4795_p3 }
  0x17   : > { %5710 = sst [smem:[#allocation19_spill]] %s4808_s28  ;;  %s232_s9 = sshll.u32 %s221_s8, 4  ;;  %s233_s9 = int_to_ptr.vmem [resolvable:$true] %s232_s9 }
  0x18   : > { %s4822_s11 = scalar_lea.sflag [#allocation7], %s217_s25  ;;  %s4721_s12 = smov 512  }
  0x19   : > { %s4722_s13 = smov 128   ;;  %s4723_s14 = smov 8  }
  0x1a   : > { %s229_s6 = scalar_lea.hbm %s5711_s1, %s4128_s27  ;;  %s4828_s22 = sadd.s32 4294967295, %s4719_s20  }
  0x1b   : > { %s230_s7 = sshll.u32 %s229_s6, 4  ;;  %s2954_s23 = sadd.s32 4294967294, %s4719_s20   ;;  %s231_s7 = int_to_ptr.hbm [resolvable:$true] %s230_s7 }
  0x1c   : > { %4437 = dma.hbm_to_vmem [thread:$0]  (!%p4818_p6), %s231_s7, 32768, %s233_s9, %s4822_s11, %s4721_s12, %s4722_s13, %s4723_s14  }
  0x1d   : > { %p93_p7 = scmp.ne.s32.totalorder %s4703_s16, %s4699_s15  ;;  %p94_p8 = scmp.eq.s32.totalorder %s4828_s22, 0 }
  0x1e   : > { %p171_p9 = scmp.eq.s32.totalorder %s4828_s22, 3  ;;  %p177_p10 = scmp.eq.s32.totalorder %s2954_s23, 3 }
  0x1f   : > { %p4837_p11 = por %p94_p8, %p93_p7  ;;  %p2955_p12 = scmp.ge.s32.totalorder %s4719_s20, 1 }
  0x20   : > { %p4845_p13 = por %p171_p9, %p87_p1  ;;  %p4849_p0 = por %p177_p10, %p93_p7 }
  0x21   : > { %p184_p2 = scmp.lt.s32.totalorder %s4719_s20, 5  ;;  %s5717_s0 = sld [smem:[#allocation21_spill]] }
  0x22   : > { %s5715_s27 = scalar_select %p4849_p0, 1, 0 }
  0x23   : > { %p4857_p3 = pnand %p2955_p12, %p184_p2  ;;  %s4724_s7 = smov [#allocation3]  }
  0x24   : > { %5716 = sst [smem:[#allocation20_spill]] %s5715_s27  ;;  %s203_s8 = sshll.u32 %s4724_s7, 4  ;;  %s204_s8 = int_to_ptr.vmem [resolvable:$true] %s203_s8 }
  0x25   : > { %p4430_p1 = pneg %p4857_p3  ;;  %s2961_s9 = sshll.u32 %s4804_s26, 1 }
  0x26   : > { %s2962_s12 = sshll.u32 %s4715_s19, 1  ;;  %s246_s13 = scalar_lea.vmem [#allocation8], %s2961_s9 }
  0x27   : > { %s201_s5 = sshll.u32 %s5717_s0, 4  ;;  %p4431_p4 = pnand %p4430_p1, %p94_p8  ;;  %s202_s5 = int_to_ptr.hbm [resolvable:$true] %s201_s5 }
  0x28   : > { %s254_s14 = sshll.u32 %s246_s13, 4  ;;  %s250_s30 = scalar_lea.hbm %s5697_s2, %s2962_s12  ;;  %s255_s14 = int_to_ptr.vmem [resolvable:$true] %s254_s14 }
  0x29   : > { %s4725_s0 = smov 1024   ;;  %s4726_s1 = smov 64  }
  0x2a   : > { %4433 = dma.hbm_to_vmem [thread:$0]  (!%p4431_p4), %s202_s5, 4096, %s204_s8, [#allocation4], %s4725_s0, %s4725_s0, %s4726_s1  }
  0x2b   : > { %s252_s21 = sshll.u32 %s250_s30, 4  ;;  %s269_s19 = scalar_lea.hbm %s5698_s3, %s2962_s12  ;;  %s253_s21 = int_to_ptr.hbm [resolvable:$true] %s252_s21 }
  0x2c   : > { %4440 = dma.hbm_to_vmem [thread:$0]  (!%p4818_p6), %s253_s21, 32, %s255_s14, %s4822_s11  }
  0x2d   : > { %s271_s17 = sshll.u32 %s269_s19, 4  ;;  %s265_s27 = scalar_lea.vmem [#allocation9], %s2961_s9  ;;  %s272_s17 = int_to_ptr.hbm [resolvable:$true] %s271_s17 }
  0x2e   : > { %s273_s13 = sshll.u32 %s265_s27, 4  ;;  %s262_s23 = scalar_lea.sflag [#allocation10], %s4804_s26  ;;  %s274_s13 = int_to_ptr.vmem [resolvable:$true] %s273_s13 }
  0x2f   : > { %4443 = dma.hbm_to_vmem [thread:$0]  (!%p4818_p6), %s272_s17, 32, %s274_s13, %s262_s23  }
  0x30   : > { %282 = sbr.rel (%p4857_p3) target bundleno = 494 (0x1ee), region = 36 }
  0x35   : > { %4682 = dma.done.wait (%p94_p8), [#allocation4], 4096  }
  0x36   : > { %4684 = vsyncadd (%p94_p8), [#allocation4], 4294963200  ;;  %s289_s0 = sand.u32 1, %s4828_s22   ;;  %s4887_s1 = sand.u32 1, %s4703_s16  }
  0x37   : > { %s2967_s19 = sshll.u32 %s4887_s1, 11  ;;  %s290_s21 = scalar_lea.sflag [#allocation7], %s289_s0 }
  0x38   : > { %s4890_s26 = scalar_lea.vmem [#allocation6], %s2967_s19 }
  0x39   : > { %4686 = dma.done.wait (%p4837_p11), %s290_s21, 32800  }
  0x3a   : > { %4688 = vsyncadd (%p4837_p11), %s290_s21, 4294934496  ;;  %s2968_s17 = sshll.u32 %s4887_s1, 1  ;;  %s310_s10 = scalar_lea.sflag [#allocation10], %s4887_s1 }
  0x3b   : > { %s4897_s28 = scalar_lea.vmem [#allocation8], %s2968_s17  ;;  %s4900_s11 = scalar_lea.vmem [#allocation9], %s2968_s17 }
  0x3c   : > { %4690 = dma.done.wait (%p4837_p11), %s310_s10, 32  }
  0x3d   : > { %4692 = vsyncadd (%p4837_p11), %s310_s10, 4294967264  ;;  %v3157_v0 = vld [vmem:[%s4890_s26 + $0x70] sm:$0xf]  ;;  %v4176_v1 = vld [vmem:[%s4890_s26 + $0x74] sm:$0xf0]  ;;  %s2970_s22 = sshll.u32 %s4887_s1, 6 }
  0x3e   : > { %v3221_v2 = vld [vmem:[%s4890_s26 + $0xf0] sm:$0xf]  ;;  %v3158_v3 = vor.u32 %v4176_v1, %v3157_v0  ;;  %v4192_v4 = vld [vmem:[%s4890_s26 + $0xf4] sm:$0xf0]  ;;  %v3149_v11 = vld [vmem:[%s4890_s26 + $0x60] sm:$0xf] }
  0x3f   : > { %v3285_v5 = vld [vmem:[%s4890_s26 + $0x170] sm:$0xf]  ;;  %v4208_v6 = vld [vmem:[%s4890_s26 + $0x174] sm:$0xf0]  ;;  %v3222_v7 = vor.u32 %v4192_v4, %v3221_v2  ;;  %v4174_v13 = vld [vmem:[%s4890_s26 + $0x64] sm:$0xf0] }
  0x40   : > { %v3286_v8 = vor.u32 %v4208_v6, %v3285_v5  ;;  %v3349_v9 = vld [vmem:[%s4890_s26 + $0x1f0] sm:$0xf]  ;;  %v4224_v10 = vld [vmem:[%s4890_s26 + $0x1f4] sm:$0xf0]  ;;  %2105 = vmatpush.bf16.msra.mxu0 %v3158_v3  ;;  %v3213_v14 = vld [vmem:[%s4890_s26 + $0xe0] sm:$0xf]  ;;  %v3150_v16 = vor.u32 %v4174_v13, %v3149_v11 }
  0x41   : > { %v3350_v12 = vor.u32 %v4224_v10, %v3349_v9  ;;  %v4190_v15 = vld [vmem:[%s4890_s26 + $0xe4] sm:$0xf0]  ;;  %2124 = vmatpush.bf16.msra.mxu1 %v3222_v7  ;;  %v3277_v18 = vld [vmem:[%s4890_s26 + $0x160] sm:$0xf]  ;;  %v3141_v23 = vld [vmem:[%s4890_s26 + $0x50] sm:$0xf] }
  0x42   : > { %2143 = vmatpush.bf16.msra.mxu2 %v3286_v8  ;;  %v3214_v17 = vor.u32 %v4190_v15, %v3213_v14  ;;  %v4206_v19 = vld [vmem:[%s4890_s26 + $0x164] sm:$0xf0]  ;;  %v3341_v20 = vld [vmem:[%s4890_s26 + $0x1e0] sm:$0xf]  ;;  %v4172_v24 = vld [vmem:[%s4890_s26 + $0x54] sm:$0xf0] }
  0x43   : > { %2162 = vmatpush.bf16.msra.mxu3 %v3350_v12  ;;  %v3278_v21 = vor.u32 %v4206_v19, %v3277_v18  ;;  %v4222_v22 = vld [vmem:[%s4890_s26 + $0x1e4] sm:$0xf0]  ;;  %v3205_v26 = vld [vmem:[%s4890_s26 + $0xd0] sm:$0xf]  ;;  %v4188_v27 = vld [vmem:[%s4890_s26 + $0xd4] sm:$0xf0]  ;;  %v3142_v29 = vor.u32 %v4172_v24, %v3141_v23 }
  0x44   : > { %v3342_v25 = vor.u32 %v4222_v22, %v3341_v20  ;;  %v3269_v28 = vld [vmem:[%s4890_s26 + $0x150] sm:$0xf]  ;;  %2106 = vmatpush.bf16.msra.mxu0 %v3150_v16  ;;  %v4204_v30 = vld [vmem:[%s4890_s26 + $0x154] sm:$0xf0]  ;;  %v3206_v33 = vor.u32 %v4188_v27, %v3205_v26  ;;  %v3133_v35 = vld [vmem:[%s4890_s26 + $0x40] sm:$0xf] }
  0x45   : > { %v3333_v31 = vld [vmem:[%s4890_s26 + $0x1d0] sm:$0xf]  ;;  %v4220_v32 = vld [vmem:[%s4890_s26 + $0x1d4] sm:$0xf0]  ;;  %2125 = vmatpush.bf16.msra.mxu1 %v3214_v17  ;;  %v3270_v34 = vor.u32 %v4204_v30, %v3269_v28  ;;  %v4170_v36 = vld [vmem:[%s4890_s26 + $0x44] sm:$0xf0] }
  0x46   : > { %2144 = vmatpush.bf16.msra.mxu2 %v3278_v21  ;;  %v3197_v37 = vld [vmem:[%s4890_s26 + $0xc0] sm:$0xf]  ;;  %v3334_v38 = vor.u32 %v4220_v32, %v3333_v31  ;;  %v4186_v39 = vld [vmem:[%s4890_s26 + $0xc4] sm:$0xf0]  ;;  %v3134_v44 = vor.u32 %v4170_v36, %v3133_v35  ;;  %v3125_v47 = vld [vmem:[%s4890_s26 + $0x30] sm:$0xf] }
  0x47   : > { %2163 = vmatpush.bf16.msra.mxu3 %v3342_v25  ;;  %v3261_v40 = vld [vmem:[%s4890_s26 + $0x140] sm:$0xf]  ;;  %v4202_v41 = vld [vmem:[%s4890_s26 + $0x144] sm:$0xf0]  ;;  %v3198_v45 = vor.u32 %v4186_v39, %v3197_v37  ;;  %v4168_v48 = vld [vmem:[%s4890_s26 + $0x34] sm:$0xf0] }
  0x48   : > { %v3325_v42 = vld [vmem:[%s4890_s26 + $0x1c0] sm:$0xf]  ;;  %v4218_v43 = vld [vmem:[%s4890_s26 + $0x1c4] sm:$0xf0]  ;;  %2107 = vmatpush.bf16.msra.mxu0 %v3142_v29  ;;  %v3262_v46 = vor.u32 %v4202_v41, %v3261_v40  ;;  %v3189_v49 = vld [vmem:[%s4890_s26 + $0xb0] sm:$0xf]  ;;  %v3126_v56 = vor.u32 %v4168_v48, %v3125_v47 }
  0x49   : > { %2126 = vmatpush.bf16.msra.mxu1 %v3206_v33  ;;  %v3326_v50 = vor.u32 %v4218_v43, %v3325_v42  ;;  %v4184_v51 = vld [vmem:[%s4890_s26 + $0xb4] sm:$0xf0]  ;;  %v3253_v52 = vld [vmem:[%s4890_s26 + $0x130] sm:$0xf]  ;;  %v3117_v59 = vld [vmem:[%s4890_s26 + $0x20] sm:$0xf] }
  0x4a   : > { %2145 = vmatpush.bf16.msra.mxu2 %v3270_v34  ;;  %v4200_v53 = vld [vmem:[%s4890_s26 + $0x134] sm:$0xf0]  ;;  %v3317_v54 = vld [vmem:[%s4890_s26 + $0x1b0] sm:$0xf]  ;;  %v3190_v57 = vor.u32 %v4184_v51, %v3189_v49  ;;  %v4166_v60 = vld [vmem:[%s4890_s26 + $0x24] sm:$0xf0] }
  0x4b   : > { %2164 = vmatpush.bf16.msra.mxu3 %v3334_v38  ;;  %v4216_v55 = vld [vmem:[%s4890_s26 + $0x1b4] sm:$0xf0]  ;;  %v3254_v58 = vor.u32 %v4200_v53, %v3253_v52  ;;  %v3181_v61 = vld [vmem:[%s4890_s26 + $0xa0] sm:$0xf]  ;;  %v4182_v63 = vld [vmem:[%s4890_s26 + $0xa4] sm:$0xf0]  ;;  %v3118_v4 = vor.u32 %v4166_v60, %v3117_v59 }
  0x4c   : > { %2108 = vmatpush.bf16.msra.mxu0 %v3134_v44  ;;  %v3318_v62 = vor.u32 %v4216_v55, %v3317_v54  ;;  %v3245_v0 = vld [vmem:[%s4890_s26 + $0x120] sm:$0xf]  ;;  %v4198_v1 = vld [vmem:[%s4890_s26 + $0x124] sm:$0xf0]  ;;  %v3182_v5 = vor.u32 %v4182_v63, %v3181_v61  ;;  %v3109_v7 = vld [vmem:[%s4890_s26 + $0x10] sm:$0xf] }
  0x4d   : > { %2127 = vmatpush.bf16.msra.mxu1 %v3198_v45  ;;  %v3309_v2 = vld [vmem:[%s4890_s26 + $0x1a0] sm:$0xf]  ;;  %v4214_v3 = vld [vmem:[%s4890_s26 + $0x1a4] sm:$0xf0]  ;;  %v3246_v6 = vor.u32 %v4198_v1, %v3245_v0  ;;  %v4164_v8 = vld [vmem:[%s4890_s26 + $0x14] sm:$0xf0] }
  0x4e   : > { %2146 = vmatpush.bf16.msra.mxu2 %v3262_v46  ;;  %v3173_v9 = vld [vmem:[%s4890_s26 + $0x90] sm:$0xf]  ;;  %v3310_v10 = vor.u32 %v4214_v3, %v3309_v2  ;;  %v4180_v11 = vld [vmem:[%s4890_s26 + $0x94] sm:$0xf0]  ;;  %v3101_v16 = vld [vmem:[%s4890_s26] sm:$0xf]  ;;  %v3110_v17 = vor.u32 %v4164_v8, %v3109_v7 }
  0x4f   : > { %2165 = vmatpush.bf16.msra.mxu3 %v3326_v50  ;;  %v3237_v12 = vld [vmem:[%s4890_s26 + $0x110] sm:$0xf]  ;;  %v4196_v13 = vld [vmem:[%s4890_s26 + $0x114] sm:$0xf0]  ;;  %v4162_v18 = vld [vmem:[%s4890_s26 + $0x4] sm:$0xf0]  ;;  %v3174_v21 = vor.u32 %v4180_v11, %v3173_v9 }
  0x50   : > { %2109 = vmatpush.bf16.msra.mxu0 %v3126_v56  ;;  %v3301_v14 = vld [vmem:[%s4890_s26 + $0x190] sm:$0xf]  ;;  %v4212_v15 = vld [vmem:[%s4890_s26 + $0x194] sm:$0xf0]  ;;  %v3165_v19 = vld [vmem:[%s4890_s26 + $0x80] sm:$0xf]  ;;  %v3238_v22 = vor.u32 %v4196_v13, %v3237_v12  ;;  %v3102_v34 = vor.u32 %v4162_v18, %v3101_v16 }
  0x51   : > { %2128 = vmatpush.bf16.msra.mxu1 %v3190_v57  ;;  %v4178_v20 = vld [vmem:[%s4890_s26 + $0x84] sm:$0xf0]  ;;  %v3229_v23 = vld [vmem:[%s4890_s26 + $0x100] sm:$0xf]  ;;  %v3302_v26 = vor.u32 %v4212_v15, %v3301_v14  ;;  %v4129_v30 = vld [vmem:[#allocation3 + $0x4] sm:$0xf] }
  0x52   : > { %2147 = vmatpush.bf16.msra.mxu2 %v3254_v58  ;;  %v4194_v24 = vld [vmem:[%s4890_s26 + $0x104] sm:$0xf0]  ;;  %v3293_v25 = vld [vmem:[%s4890_s26 + $0x180] sm:$0xf]  ;;  %v2975_v31 = vld [vmem:[#allocation3 + $0x40] sm:$0xf0]  ;;  %v3166_v38 = vor.u32 %v4178_v20, %v3165_v19 }
  0x53   : > { %2166 = vmatpush.bf16.msra.mxu3 %v3318_v62  ;;  %v4210_v27 = vld [vmem:[%s4890_s26 + $0x184] sm:$0xf0]  ;;  %v2973_v28 = vld [vmem:[#allocation3] sm:$0xf]  ;;  %v3541_v32 = vld [vmem:[%s4890_s26 + $0x370] sm:$0xf]  ;;  %v3230_v39 = vor.u32 %v4194_v24, %v3229_v23  ;;  %v4982_v53 = vor.u32 %v4129_v30, %v2975_v31 }
  0x54   : > { %2110 = vmatpush.bf16.msra.mxu0 %v3118_v4  ;;  %v4137_v29 = vld [vmem:[#allocation3 + $0x3c] sm:$0xf0]  ;;  %v4272_v33 = vld [vmem:[%s4890_s26 + $0x374] sm:$0xf0]  ;;  %v2981_v35 = vld [vmem:[#allocation3 + $0x8] sm:$0xf]  ;;  %v3294_v43 = vor.u32 %v4210_v27, %v3293_v25 }
  0x55   : > { %2129 = vmatpush.bf16.msra.mxu1 %v3182_v5  ;;  %v3477_v36 = vld [vmem:[%s4890_s26 + $0x2f0] sm:$0xf]  ;;  %v4256_v37 = vld [vmem:[%s4890_s26 + $0x2f4] sm:$0xf0]  ;;  %v4138_v40 = vld [vmem:[#allocation3 + $0x44] sm:$0xf0]  ;;  %v3542_v44 = vor.u32 %v4272_v33, %v3541_v32  ;;  %v4977_v48 = vor.u32 %v4137_v29, %v2973_v28 }
  0x56   : > { %2148 = vmatpush.bf16.msra.mxu2 %v3246_v6  ;;  %v4130_v41 = vld [vmem:[#allocation3 + $0xc] sm:$0xf]  ;;  %v3413_v45 = vld [vmem:[%s4890_s26 + $0x270] sm:$0xf]  ;;  %v4240_v46 = vld [vmem:[%s4890_s26 + $0x274] sm:$0xf0]  ;;  %v3478_v49 = vor.u32 %v4256_v37, %v3477_v36  ;;  %v4984_v54 = vor.u32 %v4138_v40, %v2981_v35 }
  0x57   : > { %2167 = vmatpush.bf16.msra.mxu3 %v3310_v10  ;;  %v2983_v42 = vld [vmem:[#allocation3 + $0x48] sm:$0xf0]  ;;  %v3605_v47 = vld [vmem:[%s4890_s26 + $0x3f0] sm:$0xf]  ;;  %v4288_v50 = vld [vmem:[%s4890_s26 + $0x3f4] sm:$0xf0]  ;;  %v3414_v58 = vor.u32 %v4240_v46, %v3413_v45 }
  0x58   : > { %2111 = vmatpush.bf16.msra.mxu0 %v3110_v17  ;;  %v3533_v51 = vld [vmem:[%s4890_s26 + $0x360] sm:$0xf]  ;;  %v4270_v52 = vld [vmem:[%s4890_s26 + $0x364] sm:$0xf0]  ;;  %v4988_v57 = vor.u32 %v4130_v41, %v2983_v42  ;;  %v3606_v59 = vor.u32 %v4288_v50, %v3605_v47  ;;  %v3525_v2 = vld [vmem:[%s4890_s26 + $0x350] sm:$0xf] }
  0x59   : > { %2130 = vmatpush.bf16.msra.mxu1 %v3174_v21  ;;  %v3469_v55 = vld [vmem:[%s4890_s26 + $0x2e0] sm:$0xf]  ;;  %v4254_v56 = vld [vmem:[%s4890_s26 + $0x2e4] sm:$0xf0]  ;;  %v3534_v60 = vor.u32 %v4270_v52, %v3533_v51  ;;  %v4268_v3 = vld [vmem:[%s4890_s26 + $0x354] sm:$0xf0] }
  0x5a   : > { %2149 = vmatpush.bf16.msra.mxu2 %v3238_v22  ;;  %v3405_v61 = vld [vmem:[%s4890_s26 + $0x260] sm:$0xf]  ;;  %v4238_v62 = vld [vmem:[%s4890_s26 + $0x264] sm:$0xf0]  ;;  %v3470_v0 = vor.u32 %v4254_v56, %v3469_v55  ;;  %v3461_v4 = vld [vmem:[%s4890_s26 + $0x2d0] sm:$0xf]  ;;  %v3526_v8 = vor.u32 %v4268_v3, %v3525_v2 }
  0x5b   : > { %2168 = vmatpush.bf16.msra.mxu3 %v3302_v26  ;;  %v3597_v63 = vld [vmem:[%s4890_s26 + $0x3e0] sm:$0xf]  ;;  %v4286_v1 = vld [vmem:[%s4890_s26 + $0x3e4] sm:$0xf0]  ;;  %v4252_v5 = vld [vmem:[%s4890_s26 + $0x2d4] sm:$0xf0]  ;;  %v3406_v6 = vor.u32 %v4238_v62, %v3405_v61 }
  0x5c   : > { %2112 = vmatpush.bf16.msra.mxu0 %v3102_v34  ;;  %v3598_v7 = vor.u32 %v4286_v1, %v3597_v63  ;;  %v3397_v9 = vld [vmem:[%s4890_s26 + $0x250] sm:$0xf]  ;;  %v4236_v10 = vld [vmem:[%s4890_s26 + $0x254] sm:$0xf0]  ;;  %v3462_v12 = vor.u32 %v4252_v5, %v3461_v4  ;;  %v3517_v14 = vld [vmem:[%s4890_s26 + $0x340] sm:$0xf] }
  0x5d   : > { %2131 = vmatpush.bf16.msra.mxu1 %v3166_v38  ;;  %v3589_v11 = vld [vmem:[%s4890_s26 + $0x3d0] sm:$0xf]  ;;  %v4284_v13 = vld [vmem:[%s4890_s26 + $0x3d4] sm:$0xf0]  ;;  %v4266_v15 = vld [vmem:[%s4890_s26 + $0x344] sm:$0xf0]  ;;  %v3398_v18 = vor.u32 %v4236_v10, %v3397_v9 }
  0x5e   : > { %2150 = vmatpush.bf16.msra.mxu2 %v3230_v39  ;;  %v3453_v16 = vld [vmem:[%s4890_s26 + $0x2c0] sm:$0xf]  ;;  %v4250_v17 = vld [vmem:[%s4890_s26 + $0x2c4] sm:$0xf0]  ;;  %v3590_v22 = vor.u32 %v4284_v13, %v3589_v11  ;;  %v3518_v23 = vor.u32 %v4266_v15, %v3517_v14  ;;  %v4145_v28 = vld [vmem:[#allocation3 + $0x84] sm:$0xf] }
  0x5f   : > { %2169 = vmatpush.bf16.msra.mxu3 %v3294_v43  ;;  %2113 = vmatmul.bf16.vlgmr.msra.gmra.mxu0 %v4977_v48  ;;  %v3389_v19 = vld [vmem:[%s4890_s26 + $0x240] sm:$0xf]  ;;  %v4234_v20 = vld [vmem:[%s4890_s26 + $0x244] sm:$0xf0]  ;;  %v3454_v27 = vor.u32 %v4250_v17, %v3453_v16  ;;  %v3039_v29 = vld [vmem:[#allocation3 + $0xc0] sm:$0xf0] }
  0x60   : > { %2132 = vmatmul.bf16.vlgmr.msra.gmra.mxu1 %v4982_v53  ;;  %2181 = vmatpush.bf16.msrb.mxu0 %v3414_v58  ;;  %v3581_v21 = vld [vmem:[%s4890_s26 + $0x3c0] sm:$0xf]  ;;  %v4282_v24 = vld [vmem:[%s4890_s26 + $0x3c4] sm:$0xf0]  ;;  %v3509_v30 = vld [vmem:[%s4890_s26 + $0x330] sm:$0xf]  ;;  %v3390_v35 = vor.u32 %v4234_v20, %v3389_v19  ;;  %v5026_v50 = vor.u32 %v4145_v28, %v3039_v29 }
  0x61   : > { %2200 = vmatpush.bf16.msrb.mxu1 %v3478_v49  ;;  %2151 = vmatmul.bf16.vlgmr.msra.gmra.mxu2 %v4984_v54  ;;  %v3037_v25 = vld [vmem:[#allocation3 + $0x80] sm:$0xf]  ;;  %v4264_v31 = vld [vmem:[%s4890_s26 + $0x334] sm:$0xf0]  ;;  %v3045_v32 = vld [vmem:[#allocation3 + $0x88] sm:$0xf]  ;;  %v3582_v39 = vor.u32 %v4282_v24, %v3581_v21 }
  0x62   : > { %2219 = vmatpush.bf16.msrb.mxu2 %v3542_v44  ;;  %2170 = vmatmul.bf16.vlgmr.msra.gmra.mxu3 %v4988_v57  ;;  %v4153_v26 = vld [vmem:[#allocation3 + $0xbc] sm:$0xf0]  ;;  %v3445_v33 = vld [vmem:[%s4890_s26 + $0x2b0] sm:$0xf]  ;;  %v4248_v34 = vld [vmem:[%s4890_s26 + $0x2b4] sm:$0xf0]  ;;  %v3510_v40 = vor.u32 %v4264_v31, %v3509_v30 }
  0x63   : > { %2238 = vmatpush.bf16.msrb.mxu3 %v3606_v59  ;;  %v4154_v36 = vld [vmem:[#allocation3 + $0xc4] sm:$0xf0]  ;;  %v4146_v37 = vld [vmem:[#allocation3 + $0x8c] sm:$0xf]  ;;  %v3381_v41 = vld [vmem:[%s4890_s26 + $0x230] sm:$0xf]  ;;  %v5021_v44 = vor.u32 %v4153_v26, %v3037_v25  ;;  %v3446_v45 = vor.u32 %v4248_v34, %v3445_v33 }
  0x64   : > { %2182 = vmatpush.bf16.msrb.mxu0 %v3406_v6  ;;  %v3047_v38 = vld [vmem:[#allocation3 + $0xc8] sm:$0xf0]  ;;  %v4232_v42 = vld [vmem:[%s4890_s26 + $0x234] sm:$0xf0]  ;;  %v3573_v43 = vld [vmem:[%s4890_s26 + $0x3b0] sm:$0xf]  ;;  %v5028_v51 = vor.u32 %v4154_v36, %v3045_v32 }
  0x65   : > { %2201 = vmatpush.bf16.msrb.mxu1 %v3470_v0  ;;  %v4280_v46 = vld [vmem:[%s4890_s26 + $0x3b4] sm:$0xf0]  ;;  %v3501_v47 = vld [vmem:[%s4890_s26 + $0x320] sm:$0xf]  ;;  %v4262_v49 = vld [vmem:[%s4890_s26 + $0x324] sm:$0xf0]  ;;  %v5032_v56 = vor.u32 %v4146_v37, %v3047_v38  ;;  %v3382_v58 = vor.u32 %v4232_v42, %v3381_v41 }
  0x66   : > { %2220 = vmatpush.bf16.msrb.mxu2 %v3534_v60  ;;  %v3437_v52 = vld [vmem:[%s4890_s26 + $0x2a0] sm:$0xf]  ;;  %v4246_v55 = vld [vmem:[%s4890_s26 + $0x2a4] sm:$0xf0]  ;;  %v3574_v59 = vor.u32 %v4280_v46, %v3573_v43  ;;  %v3502_v60 = vor.u32 %v4262_v49, %v3501_v47  ;;  %v3493_v2 = vld [vmem:[%s4890_s26 + $0x310] sm:$0xf] }
  0x67   : > { %2239 = vmatpush.bf16.msrb.mxu3 %v3598_v7  ;;  %v3373_v61 = vld [vmem:[%s4890_s26 + $0x220] sm:$0xf]  ;;  %v4230_v62 = vld [vmem:[%s4890_s26 + $0x224] sm:$0xf0]  ;;  %v3438_v0 = vor.u32 %v4246_v55, %v3437_v52  ;;  %v4260_v3 = vld [vmem:[%s4890_s26 + $0x314] sm:$0xf0] }
  0x68   : > { %2183 = vmatpush.bf16.msrb.mxu0 %v3398_v18  ;;  %v3565_v63 = vld [vmem:[%s4890_s26 + $0x3a0] sm:$0xf]  ;;  %v4278_v1 = vld [vmem:[%s4890_s26 + $0x3a4] sm:$0xf0]  ;;  %v3429_v4 = vld [vmem:[%s4890_s26 + $0x290] sm:$0xf]  ;;  %v3374_v6 = vor.u32 %v4230_v62, %v3373_v61  ;;  %v3494_v9 = vor.u32 %v4260_v3, %v3493_v2 }
  0x69   : > { %2202 = vmatpush.bf16.msrb.mxu1 %v3462_v12  ;;  %v4244_v5 = vld [vmem:[%s4890_s26 + $0x294] sm:$0xf0]  ;;  %v3365_v7 = vld [vmem:[%s4890_s26 + $0x210] sm:$0xf]  ;;  %v3485_v14 = vld [vmem:[%s4890_s26 + $0x300] sm:$0xf] }
  0x6a   : > { %2221 = vmatpush.bf16.msrb.mxu2 %v3526_v8  ;;  %v3566_v8 = vor.u32 %v4278_v1, %v3565_v63  ;;  %v4228_v10 = vld [vmem:[%s4890_s26 + $0x214] sm:$0xf0]  ;;  %v3557_v11 = vld [vmem:[%s4890_s26 + $0x390] sm:$0xf]  ;;  %v3430_v13 = vor.u32 %v4244_v5, %v3429_v4  ;;  %v4258_v15 = vld [vmem:[%s4890_s26 + $0x304] sm:$0xf0] }
  0x6b   : > { %2240 = vmatpush.bf16.msrb.mxu3 %v3590_v22  ;;  %v4276_v12 = vld [vmem:[%s4890_s26 + $0x394] sm:$0xf0]  ;;  %v3421_v16 = vld [vmem:[%s4890_s26 + $0x280] sm:$0xf]  ;;  %v4242_v17 = vld [vmem:[%s4890_s26 + $0x284] sm:$0xf0]  ;;  %v3366_v20 = vor.u32 %v4228_v10, %v3365_v7  ;;  %v3486_v25 = vor.u32 %v4258_v15, %v3485_v14 }
  0x6c   : > { %2184 = vmatpush.bf16.msrb.mxu0 %v3390_v35  ;;  %v3797_v18 = vld [vmem:[%s4890_s26 + $0x570] sm:$0xf]  ;;  %v4336_v19 = vld [vmem:[%s4890_s26 + $0x574] sm:$0xf0]  ;;  %v3357_v21 = vld [vmem:[%s4890_s26 + $0x200] sm:$0xf]  ;;  %v3558_v24 = vor.u32 %v4276_v12, %v3557_v11  ;;  %v3422_v29 = vor.u32 %v4242_v17, %v3421_v16 }
  0x6d   : > { %2203 = vmatpush.bf16.msrb.mxu1 %v3454_v27  ;;  %v3733_v22 = vld [vmem:[%s4890_s26 + $0x4f0] sm:$0xf]  ;;  %v4226_v26 = vld [vmem:[%s4890_s26 + $0x204] sm:$0xf0]  ;;  %v3549_v27 = vld [vmem:[%s4890_s26 + $0x380] sm:$0xf]  ;;  %v3798_v34 = vor.u32 %v4336_v19, %v3797_v18 }
  0x6e   : > { %2222 = vmatpush.bf16.msrb.mxu2 %v3518_v23  ;;  %v4320_v23 = vld [vmem:[%s4890_s26 + $0x4f4] sm:$0xf0]  ;;  %v4274_v28 = vld [vmem:[%s4890_s26 + $0x384] sm:$0xf0]  ;;  %v2989_v30 = vld [vmem:[#allocation3 + $0x10] sm:$0xf]  ;;  %v3358_v42 = vor.u32 %v4226_v26, %v3357_v21 }
  0x6f   : > { %2241 = vmatpush.bf16.msrb.mxu3 %v3582_v39  ;;  %2118 = vmatmul.bf16.gmra.mxu0 %v5021_v44  ;;  %v4139_v31 = vld [vmem:[#allocation3 + $0x4c] sm:$0xf0]  ;;  %v4131_v32 = vld [vmem:[#allocation3 + $0x14] sm:$0xf]  ;;  %v4304_v36 = vld [vmem:[%s4890_s26 + $0x474] sm:$0xf0]  ;;  %v3734_v38 = vor.u32 %v4320_v23, %v3733_v22  ;;  %v3550_v47 = vor.u32 %v4274_v28, %v3549_v27 }
  0x70   : > { %2137 = vmatmul.bf16.gmra.mxu1 %v5026_v50  ;;  %2185 = vmatpush.bf16.msrb.mxu0 %v3382_v58  ;;  %v2991_v33 = vld [vmem:[#allocation3 + $0x50] sm:$0xf0]  ;;  %v3669_v35 = vld [vmem:[%s4890_s26 + $0x470] sm:$0xf]  ;;  %v4352_v39 = vld [vmem:[%s4890_s26 + $0x5f4] sm:$0xf0] }
  0x71   : > { %2204 = vmatpush.bf16.msrb.mxu1 %v3446_v45  ;;  %2156 = vmatmul.bf16.gmra.mxu2 %v5028_v51  ;;  %v3861_v37 = vld [vmem:[%s4890_s26 + $0x5f0] sm:$0xf]  ;;  %v4334_v41 = vld [vmem:[%s4890_s26 + $0x564] sm:$0xf0]  ;;  %v2997_v43 = vld [vmem:[#allocation3 + $0x18] sm:$0xf]  ;;  %v3670_v52 = vor.u32 %v4304_v36, %v3669_v35  ;;  %v5075_v1 = vor.u32 %v4131_v32, %v2991_v33 }
  0x72   : > { %2223 = vmatpush.bf16.msrb.mxu2 %v3510_v40  ;;  %2175 = vmatmul.bf16.gmra.mxu3 %v5032_v56  ;;  %v3789_v40 = vld [vmem:[%s4890_s26 + $0x560] sm:$0xf]  ;;  %v4140_v45 = vld [vmem:[#allocation3 + $0x54] sm:$0xf0]  ;;  %v4132_v46 = vld [vmem:[#allocation3 + $0x1c] sm:$0xf] }
  0x73   : > { %2242 = vmatpush.bf16.msrb.mxu3 %v3574_v59  ;;  %v2999_v49 = vld [vmem:[#allocation3 + $0x58] sm:$0xf0]  ;;  %v3661_v55 = vld [vmem:[%s4890_s26 + $0x460] sm:$0xf]  ;;  %v4302_v58 = vld [vmem:[%s4890_s26 + $0x464] sm:$0xf0]  ;;  %v3862_v59 = vor.u32 %v4352_v39, %v3861_v37  ;;  %v5080_v5 = vor.u32 %v4140_v45, %v2997_v43 }
  0x74   : > { %2186 = vmatpush.bf16.msrb.mxu0 %v3374_v6  ;;  %v3725_v61 = vld [vmem:[%s4890_s26 + $0x4e0] sm:$0xf]  ;;  %v4318_v62 = vld [vmem:[%s4890_s26 + $0x4e4] sm:$0xf0]  ;;  %v3781_v3 = vld [vmem:[%s4890_s26 + $0x550] sm:$0xf]  ;;  %v5082_v6 = vor.u32 %v4132_v46, %v2999_v49  ;;  %v3662_v7 = vor.u32 %v4302_v58, %v3661_v55 }
  0x75   : > { %2205 = vmatpush.bf16.msrb.mxu1 %v3438_v0  ;;  %v3853_v63 = vld [vmem:[%s4890_s26 + $0x5e0] sm:$0xf]  ;;  %v5073_v0 = vor.u32 %v4139_v31, %v2989_v30  ;;  %v4350_v2 = vld [vmem:[%s4890_s26 + $0x5e4] sm:$0xf0]  ;;  %v4332_v4 = vld [vmem:[%s4890_s26 + $0x554] sm:$0xf0] }
  0x76   : > { %2224 = vmatpush.bf16.msrb.mxu2 %v3502_v60  ;;  %v3790_v60 = vor.u32 %v4334_v41, %v3789_v40  ;;  %v4300_v10 = vld [vmem:[%s4890_s26 + $0x454] sm:$0xf0]  ;;  %v3854_v11 = vor.u32 %v4350_v2, %v3853_v63  ;;  %v3782_v12 = vor.u32 %v4332_v4, %v3781_v3  ;;  %v3845_v15 = vld [vmem:[%s4890_s26 + $0x5d0] sm:$0xf]  ;;  %v3773_v17 = vld [vmem:[%s4890_s26 + $0x540] sm:$0xf] }
  0x77   : > { %2243 = vmatpush.bf16.msrb.mxu3 %v3566_v8  ;;  %v3726_v8 = vor.u32 %v4318_v62, %v3725_v61  ;;  %v4316_v14 = vld [vmem:[%s4890_s26 + $0x4d4] sm:$0xf0]  ;;  %v4330_v18 = vld [vmem:[%s4890_s26 + $0x544] sm:$0xf0]  ;;  %v3645_v21 = vld [vmem:[%s4890_s26 + $0x440] sm:$0xf] }
  0x78   : > { %2187 = vmatpush.bf16.msrb.mxu0 %v3366_v20  ;;  %v4348_v16 = vld [vmem:[%s4890_s26 + $0x5d4] sm:$0xf0]  ;;  %v4298_v22 = vld [vmem:[%s4890_s26 + $0x444] sm:$0xf0]  ;;  %v3837_v27 = vld [vmem:[%s4890_s26 + $0x5c0] sm:$0xf] }
  0x79   : > { %2206 = vmatpush.bf16.msrb.mxu1 %v3430_v13  ;;  %v3717_v13 = vld [vmem:[%s4890_s26 + $0x4d0] sm:$0xf]  ;;  %v3846_v23 = vor.u32 %v4348_v16, %v3845_v15  ;;  %v4314_v26 = vld [vmem:[%s4890_s26 + $0x4c4] sm:$0xf0]  ;;  %v4328_v30 = vld [vmem:[%s4890_s26 + $0x534] sm:$0xf0]  ;;  %v3646_v31 = vor.u32 %v4298_v22, %v3645_v21 }
  0x7a   : > { %2225 = vmatpush.bf16.msrb.mxu2 %v3494_v9  ;;  %v3653_v9 = vld [vmem:[%s4890_s26 + $0x450] sm:$0xf]  ;;  %v3718_v20 = vor.u32 %v4316_v14, %v3717_v13  ;;  %v4346_v28 = vld [vmem:[%s4890_s26 + $0x5c4] sm:$0xf0]  ;;  %v3055_v39 = vld [vmem:[#allocation3 + $0xd0] sm:$0xf0] }
  0x7b   : > { %2244 = vmatpush.bf16.msrb.mxu3 %v3558_v24  ;;  %v3654_v19 = vor.u32 %v4300_v10, %v3653_v9  ;;  %v3774_v24 = vor.u32 %v4330_v18, %v3773_v17  ;;  %v3637_v33 = vld [vmem:[%s4890_s26 + $0x430] sm:$0xf]  ;;  %v3838_v35 = vor.u32 %v4346_v28, %v3837_v27  ;;  %v4344_v45 = vld [vmem:[%s4890_s26 + $0x5b4] sm:$0xf0]  ;;  %v3757_v46 = vld [vmem:[%s4890_s26 + $0x520] sm:$0xf] }
  0x7c   : > { %2188 = vmatpush.bf16.msrb.mxu0 %v3358_v42  ;;  %v3053_v36 = vld [vmem:[#allocation3 + $0x90] sm:$0xf]  ;;  %v4312_v42 = vld [vmem:[%s4890_s26 + $0x4b4] sm:$0xf0]  ;;  %v4148_v55 = vld [vmem:[#allocation3 + $0x9c] sm:$0xf] }
  0x7d   : > { %2207 = vmatpush.bf16.msrb.mxu1 %v3422_v29  ;;  %v3765_v29 = vld [vmem:[%s4890_s26 + $0x530] sm:$0xf]  ;;  %v3061_v49 = vld [vmem:[#allocation3 + $0x98] sm:$0xf]  ;;  %v3063_v58 = vld [vmem:[#allocation3 + $0xd8] sm:$0xf0] }
  0x7e   : > { %2226 = vmatpush.bf16.msrb.mxu2 %v3486_v25  ;;  %v3709_v25 = vld [vmem:[%s4890_s26 + $0x4c0] sm:$0xf]  ;;  %v4155_v37 = vld [vmem:[#allocation3 + $0xcc] sm:$0xf0]  ;;  %v3766_v40 = vor.u32 %v4328_v30, %v3765_v29  ;;  %v4294_v62 = vld [vmem:[%s4890_s26 + $0x424] sm:$0xf0]  ;;  %v5126_v14 = vor.u32 %v4148_v55, %v3063_v58 }
  0x7f   : > { %2245 = vmatpush.bf16.msrb.mxu3 %v3550_v47  ;;  %2189 = vmatmul.bf16.vlgmr.msrb.gmra.mxu0 %v5073_v0  ;;  %v3710_v32 = vor.u32 %v4314_v26, %v3709_v25  ;;  %v3701_v41 = vld [vmem:[%s4890_s26 + $0x4b0] sm:$0xf]  ;;  %v4326_v47 = vld [vmem:[%s4890_s26 + $0x524] sm:$0xf0]  ;;  %v3629_v61 = vld [vmem:[%s4890_s26 + $0x420] sm:$0xf] }
  0x80   : > { %2257 = vmatpush.bf16.msra.mxu0 %v3670_v52  ;;  %2208 = vmatmul.bf16.vlgmr.msrb.gmra.mxu1 %v5075_v1  ;;  %v3829_v43 = vld [vmem:[%s4890_s26 + $0x5b0] sm:$0xf]  ;;  %v4156_v52 = vld [vmem:[#allocation3 + $0xd4] sm:$0xf0]  ;;  %v3758_v2 = vor.u32 %v4326_v47, %v3757_v46  ;;  %v3693_v3 = vld [vmem:[%s4890_s26 + $0x4a0] sm:$0xf]  ;;  %v3630_v15 = vor.u32 %v4294_v62, %v3629_v61 }
  0x81   : > { %2276 = vmatpush.bf16.msra.mxu1 %v3734_v38  ;;  %2227 = vmatmul.bf16.vlgmr.msrb.gmra.mxu2 %v5080_v5  ;;  %v4147_v38 = vld [vmem:[#allocation3 + $0x94] sm:$0xf]  ;;  %v3830_v63 = vor.u32 %v4344_v45, %v3829_v43  ;;  %v4310_v4 = vld [vmem:[%s4890_s26 + $0x4a4] sm:$0xf0]  ;;  %v5124_v13 = vor.u32 %v4156_v52, %v3061_v49  ;;  %v3621_v17 = vld [vmem:[%s4890_s26 + $0x410] sm:$0xf] }
  0x82   : > { %2295 = vmatpush.bf16.msra.mxu2 %v3798_v34  ;;  %2246 = vmatmul.bf16.vlgmr.msrb.gmra.mxu3 %v5082_v6  ;;  %v4296_v34 = vld [vmem:[%s4890_s26 + $0x434] sm:$0xf0]  ;;  %v5119_v9 = vor.u32 %v4147_v38, %v3055_v39  ;;  %v4342_v10 = vld [vmem:[%s4890_s26 + $0x5a4] sm:$0xf0]  ;;  %v3694_v16 = vor.u32 %v4310_v4, %v3693_v3  ;;  %v3685_v21 = vld [vmem:[%s4890_s26 + $0x490] sm:$0xf] }
  0x83   : > { %2314 = vmatpush.bf16.msra.mxu3 %v3862_v59  ;;  %v3638_v59 = vor.u32 %v4296_v34, %v3637_v33  ;;  %v4292_v18 = vld [vmem:[%s4890_s26 + $0x414] sm:$0xf0]  ;;  %v3741_v25 = vld [vmem:[%s4890_s26 + $0x500] sm:$0xf]  ;;  %v4322_v26 = vld [vmem:[%s4890_s26 + $0x504] sm:$0xf0] }
  0x84   : > { %2258 = vmatpush.bf16.msra.mxu0 %v3662_v7  ;;  %v3821_v7 = vld [vmem:[%s4890_s26 + $0x5a0] sm:$0xf]  ;;  %v4308_v22 = vld [vmem:[%s4890_s26 + $0x494] sm:$0xf0]  ;;  %v4053_v27 = vld [vmem:[%s4890_s26 + $0x770] sm:$0xf]  ;;  %v3622_v29 = vor.u32 %v4292_v18, %v3621_v17 }
  0x85   : > { %2277 = vmatpush.bf16.msra.mxu1 %v3726_v8  ;;  %v5117_v8 = vor.u32 %v4155_v37, %v3053_v36  ;;  %v4400_v28 = vld [vmem:[%s4890_s26 + $0x774] sm:$0xf0]  ;;  %v3686_v30 = vor.u32 %v4308_v22, %v3685_v21  ;;  %v3677_v33 = vld [vmem:[%s4890_s26 + $0x480] sm:$0xf]  ;;  %v4306_v36 = vld [vmem:[%s4890_s26 + $0x484] sm:$0xf0] }
  0x86   : > { %2296 = vmatpush.bf16.msra.mxu2 %v3790_v60  ;;  %v3702_v60 = vor.u32 %v4312_v42, %v3701_v41  ;;  %v3805_v37 = vld [vmem:[%s4890_s26 + $0x580] sm:$0xf]  ;;  %v4338_v38 = vld [vmem:[%s4890_s26 + $0x584] sm:$0xf0]  ;;  %v4054_v39 = vor.u32 %v4400_v28, %v4053_v27  ;;  %v4368_v41 = vld [vmem:[%s4890_s26 + $0x674] sm:$0xf0]  ;;  %v3678_v49 = vor.u32 %v4306_v36, %v3677_v33 }
  0x87   : > { %2315 = vmatpush.bf16.msra.mxu3 %v3854_v11  ;;  %v3749_v11 = vld [vmem:[%s4890_s26 + $0x510] sm:$0xf]  ;;  %v4384_v43 = vld [vmem:[%s4890_s26 + $0x6f4] sm:$0xf0]  ;;  %v4045_v52 = vld [vmem:[%s4890_s26 + $0x760] sm:$0xf]  ;;  %v3806_v58 = vor.u32 %v4338_v38, %v3805_v37 }
  0x88   : > { %2259 = vmatpush.bf16.msra.mxu0 %v3654_v19  ;;  %v3822_v19 = vor.u32 %v4342_v10, %v3821_v7  ;;  %v3989_v42 = vld [vmem:[%s4890_s26 + $0x6f0] sm:$0xf]  ;;  %v4416_v46 = vld [vmem:[%s4890_s26 + $0x7f4] sm:$0xf0]  ;;  %v4398_v55 = vld [vmem:[%s4890_s26 + $0x764] sm:$0xf0] }
  0x89   : > { %2278 = vmatpush.bf16.msra.mxu1 %v3718_v20  ;;  %v4117_v45 = vld [vmem:[%s4890_s26 + $0x7f0] sm:$0xf]  ;;  %v4133_v61 = vld [vmem:[#allocation3 + $0x24] sm:$0xf]  ;;  %v3917_v4 = vld [vmem:[%s4890_s26 + $0x660] sm:$0xf] }
  0x8a   : > { %2297 = vmatpush.bf16.msra.mxu2 %v3782_v12  ;;  %v4324_v12 = vld [vmem:[%s4890_s26 + $0x514] sm:$0xf0]  ;;  %v4118_v3 = vor.u32 %v4416_v46, %v4117_v45  ;;  %v4366_v7 = vld [vmem:[%s4890_s26 + $0x664] sm:$0xf0]  ;;  %v3981_v17 = vld [vmem:[%s4890_s26 + $0x6e0] sm:$0xf] }
  0x8b   : > { %2316 = vmatpush.bf16.msra.mxu3 %v3846_v23  ;;  %v3750_v20 = vor.u32 %v4324_v12, %v3749_v11  ;;  %v3813_v23 = vld [vmem:[%s4890_s26 + $0x590] sm:$0xf]  ;;  %v3013_v10 = vld [vmem:[#allocation3 + $0x28] sm:$0xf]  ;;  %v4134_v12 = vld [vmem:[#allocation3 + $0x2c] sm:$0xf] }
  0x8c   : > { %2260 = vmatpush.bf16.msra.mxu0 %v3646_v31  ;;  %v3613_v31 = vld [vmem:[%s4890_s26 + $0x400] sm:$0xf]  ;;  %v4142_v11 = vld [vmem:[#allocation3 + $0x64] sm:$0xf0]  ;;  %v4037_v22 = vld [vmem:[%s4890_s26 + $0x750] sm:$0xf] }
  0x8d   : > { %2279 = vmatpush.bf16.msra.mxu1 %v3710_v32  ;;  %v4290_v32 = vld [vmem:[%s4890_s26 + $0x404] sm:$0xf0]  ;;  %v4364_v27 = vld [vmem:[%s4890_s26 + $0x654] sm:$0xf0]  ;;  %v5170_v28 = vor.u32 %v4142_v11, %v3013_v10  ;;  %v4101_v36 = vld [vmem:[%s4890_s26 + $0x7d0] sm:$0xf] }
  0x8e   : > { %2298 = vmatpush.bf16.msra.mxu2 %v3774_v24  ;;  %v4340_v24 = vld [vmem:[%s4890_s26 + $0x594] sm:$0xf0]  ;;  %v3614_v47 = vor.u32 %v4290_v32, %v3613_v31  ;;  %v4382_v18 = vld [vmem:[%s4890_s26 + $0x6e4] sm:$0xf0]  ;;  %v3973_v32 = vld [vmem:[%s4890_s26 + $0x6d0] sm:$0xf] }
  0x8f   : > { %2317 = vmatpush.bf16.msra.mxu3 %v3838_v35  ;;  %2194 = vmatmul.bf16.gmra.mxu0 %v5117_v8  ;;  %v3814_v34 = vor.u32 %v4340_v24, %v3813_v23  ;;  %v3742_v35 = vor.u32 %v4322_v26, %v3741_v25  ;;  %v4414_v21 = vld [vmem:[%s4890_s26 + $0x7e4] sm:$0xf0]  ;;  %v4396_v25 = vld [vmem:[%s4890_s26 + $0x754] sm:$0xf0]  ;;  %v3909_v26 = vld [vmem:[%s4890_s26 + $0x650] sm:$0xf] }
  0x90   : > { %2261 = vmatpush.bf16.msra.mxu0 %v3638_v59  ;;  %2213 = vmatmul.bf16.gmra.mxu1 %v5119_v9  ;;  %v3005_v59 = vld [vmem:[#allocation3 + $0x20] sm:$0xf]  ;;  %v4380_v33 = vld [vmem:[%s4890_s26 + $0x6d4] sm:$0xf0]  ;;  %v4378_v46 = vld [vmem:[%s4890_s26 + $0x6c4] sm:$0xf0] }
  0x91   : > { %2280 = vmatpush.bf16.msra.mxu1 %v3702_v60  ;;  %2232 = vmatmul.bf16.gmra.mxu2 %v5124_v13  ;;  %v4141_v60 = vld [vmem:[#allocation3 + $0x5c] sm:$0xf0]  ;;  %v4412_v37 = vld [vmem:[%s4890_s26 + $0x7d4] sm:$0xf0]  ;;  %v4149_v10 = vld [vmem:[#allocation3 + $0xa4] sm:$0xf] }
  0x92   : > { %2299 = vmatpush.bf16.msra.mxu2 %v3766_v40  ;;  %2251 = vmatmul.bf16.gmra.mxu3 %v5126_v14  ;;  %v3925_v40 = vld [vmem:[%s4890_s26 + $0x670] sm:$0xf]  ;;  %v5163_v23 = vor.u32 %v4141_v60, %v3005_v59  ;;  %v4029_v38 = vld [vmem:[%s4890_s26 + $0x740] sm:$0xf]  ;;  %v4392_v59 = vld [vmem:[%s4890_s26 + $0x734] sm:$0xf0] }
  0x93   : > { %2318 = vmatpush.bf16.msra.mxu3 %v3830_v63  ;;  %v3926_v62 = vor.u32 %v4368_v41, %v3925_v40  ;;  %v3007_v63 = vld [vmem:[#allocation3 + $0x60] sm:$0xf0]  ;;  %v3901_v40 = vld [vmem:[%s4890_s26 + $0x640] sm:$0xf]  ;;  %v4362_v41 = vld [vmem:[%s4890_s26 + $0x644] sm:$0xf0] }
  0x94   : > { %2262 = vmatpush.bf16.msra.mxu0 %v3630_v15  ;;  %v4046_v15 = vor.u32 %v4398_v55, %v4045_v52  ;;  %v5165_v24 = vor.u32 %v4133_v61, %v3007_v63  ;;  %v3965_v45 = vld [vmem:[%s4890_s26 + $0x6c0] sm:$0xf]  ;;  %v4410_v55 = vld [vmem:[%s4890_s26 + $0x7c4] sm:$0xf0]  ;;  %v3893_v60 = vld [vmem:[%s4890_s26 + $0x630] sm:$0xf] }
  0x95   : > { %2281 = vmatpush.bf16.msra.mxu1 %v3694_v16  ;;  %v3015_v16 = vld [vmem:[#allocation3 + $0x68] sm:$0xf0]  ;;  %v4093_v52 = vld [vmem:[%s4890_s26 + $0x7c0] sm:$0xf]  ;;  %v4360_v61 = vld [vmem:[%s4890_s26 + $0x634] sm:$0xf0] }
  0x96   : > { %2300 = vmatpush.bf16.msra.mxu2 %v3758_v2  ;;  %v3990_v2 = vor.u32 %v4384_v43, %v3989_v42  ;;  %v3974_v42 = vor.u32 %v4380_v33, %v3973_v32  ;;  %v4102_v43 = vor.u32 %v4412_v37, %v4101_v36  ;;  %v4094_v63 = vor.u32 %v4410_v55, %v4093_v52  ;;  %v3071_v11 = vld [vmem:[#allocation3 + $0xe0] sm:$0xf0]  ;;  %v3949_v32 = vld [vmem:[%s4890_s26 + $0x6a0] sm:$0xf]  ;;  %v4374_v33 = vld [vmem:[%s4890_s26 + $0x6a4] sm:$0xf0] }
  0x97   : > { %2319 = vmatpush.bf16.msra.mxu3 %v3822_v19  ;;  %v3918_v19 = vor.u32 %v4366_v7, %v3917_v4  ;;  %v3069_v4 = vld [vmem:[#allocation3 + $0xa0] sm:$0xf]  ;;  %v4406_v37 = vld [vmem:[%s4890_s26 + $0x7a4] sm:$0xf0]  ;;  %v3941_v52 = vld [vmem:[%s4890_s26 + $0x690] sm:$0xf] }
  0x98   : > { %2263 = vmatpush.bf16.msra.mxu0 %v3622_v29  ;;  %v5172_v29 = vor.u32 %v4134_v12, %v3015_v16  ;;  %v4157_v7 = vld [vmem:[#allocation3 + $0xdc] sm:$0xf0]  ;;  %v4085_v16 = vld [vmem:[%s4890_s26 + $0x7b0] sm:$0xf]  ;;  %v4372_v55 = vld [vmem:[%s4890_s26 + $0x694] sm:$0xf0] }
  0x99   : > { %2282 = vmatpush.bf16.msra.mxu1 %v3686_v30  ;;  %v3982_v30 = vor.u32 %v4382_v18, %v3981_v17  ;;  %v4408_v17 = vld [vmem:[%s4890_s26 + $0x7b4] sm:$0xf0]  ;;  %v4013_v18 = vld [vmem:[%s4890_s26 + $0x720] sm:$0xf]  ;;  %s5641_s24 = scalar_lea.vmem [#allocation11], %s2970_s22  ;;  %s4417_s27 = sshll.u32 %s4711_s18, 4 }
  0x9a   : > { %2301 = vmatpush.bf16.msra.mxu2 %v3750_v20  ;;  %v4109_v20 = vld [vmem:[%s4890_s26 + $0x7e0] sm:$0xf]  ;;  %s2799_s8 = scalar_lea.hbm %s5699_s4, %s4417_s27  ;;  %s2800_s9 = sshll.u32 %s5641_s24, 4  ;;  %s2801_s9 = int_to_ptr.vmem [resolvable:$true] %s2800_s9 }
  0x9b   : > { %2320 = vmatpush.bf16.msra.mxu3 %v3814_v34  ;;  %v4110_v31 = vor.u32 %v4414_v21, %v4109_v20  ;;  %v4038_v34 = vor.u32 %v4396_v25, %v4037_v22  ;;  %v3885_v20 = vld [vmem:[%s4890_s26 + $0x620] sm:$0xf]  ;;  %v4358_v21 = vld [vmem:[%s4890_s26 + $0x624] sm:$0xf0]  ;;  %s2802_s12 = sshll.u32 %s2799_s8, 4  ;;  %s2785_s18 = scalar_lea.sflag [#allocation5], %s4887_s1  ;;  %s2803_s12 = int_to_ptr.hbm [resolvable:$true] %s2802_s12 }
  0x9c   : > { %2264 = vmatpush.bf16.msra.mxu0 %v3614_v47  ;;  %v3077_v22 = vld [vmem:[#allocation3 + $0xa8] sm:$0xf]  ;;  %v4077_v36 = vld [vmem:[%s4890_s26 + $0x7a0] sm:$0xf]  ;;  %s4643_s14 = sshra.s32 %s2803_s12, 4  ;;  %s4649_s13 = scalar_lea.hbm %s5699_s4, 256  ;;  %s4644_s14 = int_to_ptr.hbm [resolvable:$true] %s4643_s14 }
  0x9d   : > { %2283 = vmatpush.bf16.msra.mxu1 %v3678_v49  ;;  %v3902_v49 = vor.u32 %v4362_v41, %v3901_v40  ;;  %v4158_v25 = vld [vmem:[#allocation3 + $0xe4] sm:$0xf0]  ;;  %v5209_v40 = vor.u32 %v4149_v10, %v3071_v11  ;;  %v4388_v41 = vld [vmem:[%s4890_s26 + $0x714] sm:$0xf0]  ;;  %v4175_v10 = vld [vmem:[%s4890_s26 + $0x74] sm:$0xf]  ;;  %p4650_p8 = scmp.lt.s32.totalorder %s4644_s14, %s5699_s4 }
  0x9e   : > { %2302 = vmatpush.bf16.msra.mxu2 %v3742_v35  ;;  %v3910_v35 = vor.u32 %v4364_v27, %v3909_v26  ;;  %v4150_v26 = vld [vmem:[#allocation3 + $0xac] sm:$0xf]  ;;  %v3159_v11 = vld [vmem:[%s4890_s26 + $0x78] sm:$0xf0]  ;;  %s4645_s29 = scalar_lea.hbm %s4644_s14, 64 }
  0x9f   : > { %2321 = vmatpush.bf16.msra.mxu3 %v3806_v58  ;;  %2265 = vmatmul.bf16.vlgmr.msra.gmra.mxu0 %v5163_v23  ;;  %v4021_v58 = vld [vmem:[%s4890_s26 + $0x730] sm:$0xf]  ;;  %v3079_v27 = vld [vmem:[#allocation3 + $0xe8] sm:$0xf0]  ;;  %p4646_p5 = scmp.ne.s32.totalorder %s4644_s14, %s4645_s29  ;;  %p4651_p9 = scmp.lt.s32.totalorder %s4649_s13, %s4645_s29 }
  0xa0   : > { %2333 = vmatpush.bf16.msrb.mxu0 %v3926_v62  ;;  %2284 = vmatmul.bf16.vlgmr.msra.gmra.mxu1 %v5165_v24  ;;  %v3966_v62 = vor.u32 %v4378_v46, %v3965_v45  ;;  %v4022_v12 = vor.u32 %v4392_v59, %v4021_v58  ;;  %v5214_v45 = vor.u32 %v4158_v25, %v3077_v22  ;;  %v4069_v58 = vld [vmem:[%s4890_s26 + $0x790] sm:$0xf]  ;;  %v4191_v22 = vld [vmem:[%s4890_s26 + $0xf4] sm:$0xf]  ;;  %v3223_v25 = vld [vmem:[%s4890_s26 + $0xf8] sm:$0xf0] }
  0xa1   : > { %2352 = vmatpush.bf16.msrb.mxu1 %v3990_v2  ;;  %2303 = vmatmul.bf16.vlgmr.msra.gmra.mxu2 %v5170_v28  ;;  %v3957_v2 = vld [vmem:[%s4890_s26 + $0x6b0] sm:$0xf]  ;;  %v5216_v46 = vor.u32 %v4150_v26, %v3079_v27  ;;  %v3162_v27 = vor.u32 %v4175_v10, %v3159_v11  ;;  %p4647_p6 = pnand %p4646_p5, %p4845_p13  ;;  %p4652_p10 = por %p4651_p9, %p4650_p8 }
  0xa2   : > { %2371 = vmatpush.bf16.msrb.mxu2 %v4054_v39  ;;  %v4394_v39 = vld [vmem:[%s4890_s26 + $0x744] sm:$0xf0]  ;;  %2322 = vmatmul.bf16.vlgmr.msra.gmra.mxu3 %v5172_v29 }
  0xa3   : > { %2390 = vmatpush.bf16.msrb.mxu3 %v4118_v3  ;;  %v4030_v47 = vor.u32 %v4394_v39, %v4029_v38  ;;  %v4376_v3 = vld [vmem:[%s4890_s26 + $0x6b4] sm:$0xf0]  ;;  %v4005_v38 = vld [vmem:[%s4890_s26 + $0x710] sm:$0xf]  ;;  %v5207_v39 = vor.u32 %v4157_v7, %v3069_v4  ;;  %v4207_v4 = vld [vmem:[%s4890_s26 + $0x174] sm:$0xf]  ;;  %p4648_p7 = pneg %p4647_p6 }
  0xa4   : > { %2334 = vmatpush.bf16.msrb.mxu0 %v3918_v19  ;;  %v4390_v19 = vld [vmem:[%s4890_s26 + $0x724] sm:$0xf0]  ;;  %v4006_v59 = vor.u32 %v4388_v41, %v4005_v38  ;;  %v3287_v7 = vld [vmem:[%s4890_s26 + $0x178] sm:$0xf0]  ;;  %v3021_v38 = vld [vmem:[#allocation3 + $0x30] sm:$0xf] }
  0xa5   : > { %2353 = vmatpush.bf16.msrb.mxu1 %v3982_v30  ;;  %v3958_v30 = vor.u32 %v4376_v3, %v3957_v2  ;;  %v3869_v2 = vld [vmem:[%s4890_s26 + $0x600] sm:$0xf]  ;;  %v4354_v3 = vld [vmem:[%s4890_s26 + $0x604] sm:$0xf0]  ;;  %v3290_v26 = vor.u32 %v4207_v4, %v3287_v7  ;;  %v4143_v41 = vld [vmem:[#allocation3 + $0x6c] sm:$0xf0]  ;;  %p4653_p11 = pnand %p4652_p10, %p4648_p7 }
  0xa6   : > { %2372 = vmatpush.bf16.msrb.mxu2 %v4046_v15  ;;  %v3894_v15 = vor.u32 %v4360_v61, %v3893_v60  ;;  %v4404_v61 = vld [vmem:[%s4890_s26 + $0x794] sm:$0xf0]  ;;  %v4203_v4 = vld [vmem:[%s4890_s26 + $0x154] sm:$0xf]  ;;  %v3271_v7 = vld [vmem:[%s4890_s26 + $0x158] sm:$0xf0] }
  0xa7   : > { %2391 = vmatpush.bf16.msrb.mxu3 %v4110_v31  ;;  %v4086_v31 = vor.u32 %v4408_v17, %v4085_v16  ;;  %v3933_v16 = vld [vmem:[%s4890_s26 + $0x680] sm:$0xf]  ;;  %v4370_v17 = vld [vmem:[%s4890_s26 + $0x684] sm:$0xf0] }
  0xa8   : > { %2335 = vmatpush.bf16.msrb.mxu0 %v3910_v35  ;;  %v3886_v35 = vor.u32 %v4358_v21, %v3885_v20  ;;  %v3870_v20 = vor.u32 %v4354_v3, %v3869_v2  ;;  %v4402_v21 = vld [vmem:[%s4890_s26 + $0x784] sm:$0xf0]  ;;  %v4136_v2 = vld [vmem:[#allocation3 + $0x3c] sm:$0xf] }
  0xa9   : > { %2354 = vmatpush.bf16.msrb.mxu1 %v3974_v42  ;;  %v3877_v42 = vld [vmem:[%s4890_s26 + $0x610] sm:$0xf]  ;;  %v3031_v3 = vld [vmem:[#allocation3 + $0x78] sm:$0xf0] }
  0xaa   : > { %2373 = vmatpush.bf16.msrb.mxu2 %v4038_v34  ;;  %v4014_v34 = vor.u32 %v4390_v19, %v4013_v18  ;;  %v4061_v18 = vld [vmem:[%s4890_s26 + $0x780] sm:$0xf] }
  0xab   : > { %2392 = vmatpush.bf16.msrb.mxu3 %v4102_v43  ;;  %v4356_v43 = vld [vmem:[%s4890_s26 + $0x614] sm:$0xf0] }
  0xac   : > { %2336 = vmatpush.bf16.msrb.mxu0 %v3902_v49  ;;  %v4078_v49 = vor.u32 %v4406_v37, %v4077_v36  ;;  %v3878_v60 = vor.u32 %v4356_v43, %v3877_v42  ;;  %v3934_v36 = vor.u32 %v4370_v17, %v3933_v16  ;;  %v4062_v37 = vor.u32 %v4402_v21, %v4061_v18  ;;  %v4135_v42 = vld [vmem:[#allocation3 + $0x34] sm:$0xf]  ;;  %v3335_v21 = vld [vmem:[%s4890_s26 + $0x1d8] sm:$0xf0] }
  0xad   : > { %2355 = vmatpush.bf16.msrb.mxu1 %v3966_v62  ;;  %v3997_v62 = vld [vmem:[%s4890_s26 + $0x700] sm:$0xf]  ;;  %v3023_v43 = vld [vmem:[#allocation3 + $0x70] sm:$0xf0]  ;;  %v5255_v17 = vor.u32 %v4143_v41, %v3021_v38  ;;  %v4217_v38 = vld [vmem:[%s4890_s26 + $0x1c4] sm:$0xf] }
  0xae   : > { %2374 = vmatpush.bf16.msrb.mxu2 %v4030_v47  ;;  %v3950_v47 = vor.u32 %v4374_v33, %v3949_v32  ;;  %v4205_v32 = vld [vmem:[%s4890_s26 + $0x164] sm:$0xf]  ;;  %v3279_v33 = vld [vmem:[%s4890_s26 + $0x168] sm:$0xf0]  ;;  %v4187_v16 = vld [vmem:[%s4890_s26 + $0xd4] sm:$0xf]  ;;  %v5257_v18 = vor.u32 %v4135_v42, %v3023_v43 }
  0xaf   : > { %2393 = vmatpush.bf16.msrb.mxu3 %v4094_v63  ;;  %v4386_v63 = vld [vmem:[%s4890_s26 + $0x704] sm:$0xf0]  ;;  %2270 = vmatmul.bf16.gmra.mxu0 %v5207_v39  ;;  %v3327_v41 = vld [vmem:[%s4890_s26 + $0x1c8] sm:$0xf0] }
  0xb0   : > { %2337 = vmatpush.bf16.msrb.mxu0 %v3894_v15  ;;  %2289 = vmatmul.bf16.gmra.mxu1 %v5209_v40  ;;  %v4070_v15 = vor.u32 %v4404_v61, %v4069_v58  ;;  %v3998_v19 = vor.u32 %v4386_v63, %v3997_v62  ;;  %v3343_v61 = vld [vmem:[%s4890_s26 + $0x1e8] sm:$0xf0]  ;;  %v3029_v62 = vld [vmem:[#allocation3 + $0x38] sm:$0xf] }
  0xb1   : > { %2356 = vmatpush.bf16.msrb.mxu1 %v3958_v30  ;;  %2308 = vmatmul.bf16.gmra.mxu2 %v5214_v45  ;;  %v4223_v30 = vld [vmem:[%s4890_s26 + $0x1f4] sm:$0xf]  ;;  %v4144_v63 = vld [vmem:[#allocation3 + $0x74] sm:$0xf0] }
  0xb2   : > { %2375 = vmatpush.bf16.msrb.mxu2 %v4022_v12  ;;  %2327 = vmatmul.bf16.gmra.mxu3 %v5216_v46  ;;  %v3942_v12 = vor.u32 %v4372_v55, %v3941_v52  ;;  %v4189_v52 = vld [vmem:[%s4890_s26 + $0xe4] sm:$0xf]  ;;  %v3282_v55 = vor.u32 %v4205_v32, %v3279_v33 }
  0xb3   : > { %2394 = vmatpush.bf16.msrb.mxu3 %v4086_v31  ;;  %v3351_v31 = vld [vmem:[%s4890_s26 + $0x1f8] sm:$0xf0] }
  0xb4   : > { %2338 = vmatpush.bf16.msrb.mxu0 %v3886_v35  ;;  %v3151_v35 = vld [vmem:[%s4890_s26 + $0x68] sm:$0xf0] }
  0xb5   : > { %2357 = vmatpush.bf16.msrb.mxu1 %v3950_v47  ;;  %v3226_v47 = vor.u32 %v4191_v22, %v3223_v25  ;;  %v5262_v22 = vor.u32 %v4144_v63, %v3029_v62  ;;  %v5264_v25 = vor.u32 %v4136_v2, %v3031_v3  ;;  %v4215_v62 = vld [vmem:[%s4890_s26 + $0x1b4] sm:$0xf]  ;;  %v3319_v63 = vld [vmem:[%s4890_s26 + $0x1b8] sm:$0xf0] }
  0xb6   : > { %2376 = vmatpush.bf16.msrb.mxu2 %v4014_v34  ;;  %v4173_v34 = vld [vmem:[%s4890_s26 + $0x64] sm:$0xf] }
  0xb7   : > { %2395 = vmatpush.bf16.msrb.mxu3 %v4078_v49  ;;  %v3354_v49 = vor.u32 %v4223_v30, %v3351_v31  ;;  %v3154_v58 = vor.u32 %v4173_v34, %v3151_v35  ;;  %v4201_v30 = vld [vmem:[%s4890_s26 + $0x144] sm:$0xf]  ;;  %v3263_v31 = vld [vmem:[%s4890_s26 + $0x148] sm:$0xf0] }
  0xb8   : > { %2339 = vmatpush.bf16.msrb.mxu0 %v3878_v60  ;;  %v4221_v60 = vld [vmem:[%s4890_s26 + $0x1e4] sm:$0xf]  ;;  %v3135_v35 = vld [vmem:[%s4890_s26 + $0x48] sm:$0xf0]  ;;  %v3266_v42 = vor.u32 %v4201_v30, %v3263_v31 }
  0xb9   : > { %2358 = vmatpush.bf16.msrb.mxu1 %v3942_v12  ;;  %v3346_v11 = vor.u32 %v4221_v60, %v3343_v61  ;;  %v4171_v12 = vld [vmem:[%s4890_s26 + $0x54] sm:$0xf]  ;;  %v4169_v34 = vld [vmem:[%s4890_s26 + $0x44] sm:$0xf]  ;;  %v3191_v61 = vld [vmem:[%s4890_s26 + $0xb8] sm:$0xf0] }
  0xba   : > { %2377 = vmatpush.bf16.msrb.mxu2 %v4006_v59  ;;  %v3215_v59 = vld [vmem:[%s4890_s26 + $0xe8] sm:$0xf0]  ;;  %v3138_v43 = vor.u32 %v4169_v34, %v3135_v35  ;;  %v4183_v60 = vld [vmem:[%s4890_s26 + $0xb4] sm:$0xf]  ;;  %v4213_v30 = vld [vmem:[%s4890_s26 + $0x1a4] sm:$0xf] }
  0xbb   : > { %2396 = vmatpush.bf16.msrb.mxu3 %v4070_v15  ;;  %v3218_v10 = vor.u32 %v4189_v52, %v3215_v59  ;;  %v3143_v15 = vld [vmem:[%s4890_s26 + $0x58] sm:$0xf0]  ;;  %v3311_v31 = vld [vmem:[%s4890_s26 + $0x1a8] sm:$0xf0] }
  0xbc   : > { %2340 = vmatpush.bf16.msrb.mxu0 %v3870_v20  ;;  %v4219_v20 = vld [vmem:[%s4890_s26 + $0x1d4] sm:$0xf]  ;;  %v3127_v59 = vld [vmem:[%s4890_s26 + $0x38] sm:$0xf0] }
  0xbd   : > { %2359 = vmatpush.bf16.msrb.mxu1 %v3934_v36  ;;  %v3338_v33 = vor.u32 %v4219_v20, %v3335_v21  ;;  %v4185_v36 = vld [vmem:[%s4890_s26 + $0xc4] sm:$0xf]  ;;  %v3119_v21 = vld [vmem:[%s4890_s26 + $0x28] sm:$0xf0]  ;;  %v4152_v34 = vld [vmem:[#allocation3 + $0xbc] sm:$0xf] }
  0xbe   : > { %2378 = vmatpush.bf16.msrb.mxu2 %v3998_v19  ;;  %v3207_v19 = vld [vmem:[%s4890_s26 + $0xd8] sm:$0xf0]  ;;  %v4165_v20 = vld [vmem:[%s4890_s26 + $0x24] sm:$0xf] }
  0xbf   : > { %2397 = vmatpush.bf16.msrb.mxu3 %v4062_v37  ;;  %v3210_v32 = vor.u32 %v4187_v16, %v3207_v19  ;;  %2341 = vmatmul.bf16.vlgmr.msrb.gmra.mxu0 %v5255_v17  ;;  %v3199_v37 = vld [vmem:[%s4890_s26 + $0xc8] sm:$0xf0]  ;;  %v3194_v16 = vor.u32 %v4183_v60, %v3191_v61  ;;  %v3322_v19 = vor.u32 %v4215_v62, %v3319_v63  ;;  %v3095_v35 = vld [vmem:[#allocation3 + $0xf8] sm:$0xf0]  ;;  %v4211_v60 = vld [vmem:[%s4890_s26 + $0x194] sm:$0xf] }
  0xc0   : > { %2409 = vmatpush.bf16.msra.mxu0 %v3162_v27  ;;  %v3146_v27 = vor.u32 %v4171_v12, %v3143_v15  ;;  %2360 = vmatmul.bf16.vlgmr.msrb.gmra.mxu1 %v5257_v18  ;;  %v3202_v52 = vor.u32 %v4185_v36, %v3199_v37  ;;  %v4151_v12 = vld [vmem:[#allocation3 + $0xb4] sm:$0xf]  ;;  %v3122_v37 = vor.u32 %v4165_v20, %v3119_v21  ;;  %v3303_v61 = vld [vmem:[%s4890_s26 + $0x198] sm:$0xf0]  ;;  %v4209_v20 = vld [vmem:[%s4890_s26 + $0x184] sm:$0xf] }
  0xc1   : > { %2428 = vmatpush.bf16.msra.mxu1 %v3226_v47  ;;  %2379 = vmatmul.bf16.vlgmr.msrb.gmra.mxu2 %v5262_v22  ;;  %v4199_v47 = vld [vmem:[%s4890_s26 + $0x134] sm:$0xf]  ;;  %v5308_v63 = vor.u32 %v4152_v34, %v3095_v35  ;;  %v3295_v21 = vld [vmem:[%s4890_s26 + $0x188] sm:$0xf0]  ;;  %v3479_v35 = vld [vmem:[%s4890_s26 + $0x2f8] sm:$0xf0] }
  0xc2   : > { %2447 = vmatpush.bf16.msra.mxu2 %v3290_v26  ;;  %v3274_v26 = vor.u32 %v4203_v4, %v3271_v7  ;;  %2398 = vmatmul.bf16.vlgmr.msrb.gmra.mxu3 %v5264_v25  ;;  %v4197_v4 = vld [vmem:[%s4890_s26 + $0x124] sm:$0xf]  ;;  %v3247_v7 = vld [vmem:[%s4890_s26 + $0x128] sm:$0xf0]  ;;  %v3087_v15 = vld [vmem:[#allocation3 + $0xf0] sm:$0xf0] }
  0xc3   : > { %2466 = vmatpush.bf16.msra.mxu3 %v3354_v49  ;;  %v3255_v49 = vld [vmem:[%s4890_s26 + $0x138] sm:$0xf0]  ;;  %v3250_v36 = vor.u32 %v4197_v4, %v3247_v7  ;;  %v3231_v7 = vld [vmem:[%s4890_s26 + $0x108] sm:$0xf0] }
  0xc4   : > { %2410 = vmatpush.bf16.msra.mxu0 %v3154_v58  ;;  %v4167_v58 = vld [vmem:[%s4890_s26 + $0x34] sm:$0xf]  ;;  %v3258_v2 = vor.u32 %v4199_v47, %v3255_v49  ;;  %v3111_v49 = vld [vmem:[%s4890_s26 + $0x18] sm:$0xf0] }
  0xc5   : > { %2429 = vmatpush.bf16.msra.mxu1 %v3218_v10  ;;  %v3130_v3 = vor.u32 %v4167_v58, %v3127_v59  ;;  %v3085_v10 = vld [vmem:[#allocation3 + $0xb0] sm:$0xf]  ;;  %v4163_v47 = vld [vmem:[%s4890_s26 + $0x14] sm:$0xf]  ;;  %v5301_v58 = vor.u32 %v4151_v12, %v3087_v15  ;;  %v3175_v59 = vld [vmem:[%s4890_s26 + $0x98] sm:$0xf0]  ;;  %v3306_v15 = vor.u32 %v4211_v60, %v3303_v61 }
  0xc6   : > { %2448 = vmatpush.bf16.msra.mxu2 %v3282_v55  ;;  %v3330_v55 = vor.u32 %v4217_v38, %v3327_v41  ;;  %v4195_v38 = vld [vmem:[%s4890_s26 + $0x114] sm:$0xf]  ;;  %v3239_v41 = vld [vmem:[%s4890_s26 + $0x118] sm:$0xf0]  ;;  %v3114_v4 = vor.u32 %v4163_v47, %v3111_v49  ;;  %v4269_v47 = vld [vmem:[%s4890_s26 + $0x364] sm:$0xf] }
  0xc7   : > { %2467 = vmatpush.bf16.msra.mxu3 %v3346_v11  ;;  %v4159_v11 = vld [vmem:[#allocation3 + $0xec] sm:$0xf0]  ;;  %v3535_v49 = vld [vmem:[%s4890_s26 + $0x368] sm:$0xf0]  ;;  %v4237_v60 = vld [vmem:[%s4890_s26 + $0x264] sm:$0xf] }
  0xc8   : > { %2411 = vmatpush.bf16.msra.mxu0 %v3146_v27  ;;  %v3183_v27 = vld [vmem:[%s4890_s26 + $0xa8] sm:$0xf0] }
  0xc9   : > { %2430 = vmatpush.bf16.msra.mxu1 %v3210_v32  ;;  %v3093_v32 = vld [vmem:[#allocation3 + $0xb8] sm:$0xf]  ;;  %v3407_v61 = vld [vmem:[%s4890_s26 + $0x268] sm:$0xf0] }
  0xca   : > { %2449 = vmatpush.bf16.msra.mxu2 %v3274_v26  ;;  %v4181_v26 = vld [vmem:[%s4890_s26 + $0xa4] sm:$0xf] }
  0xcb   : > { %2468 = vmatpush.bf16.msra.mxu3 %v3338_v33  ;;  %v4160_v33 = vld [vmem:[#allocation3 + $0xf4] sm:$0xf0] }
  0xcc   : > { %2412 = vmatpush.bf16.msra.mxu0 %v3138_v43  ;;  %v3314_v43 = vor.u32 %v4213_v30, %v3311_v31  ;;  %v5306_v62 = vor.u32 %v4160_v33, %v3093_v32  ;;  %v4239_v30 = vld [vmem:[%s4890_s26 + $0x274] sm:$0xf]  ;;  %v3415_v31 = vld [vmem:[%s4890_s26 + $0x278] sm:$0xf0] }
  0xcd   : > { %2431 = vmatpush.bf16.msra.mxu1 %v3202_v52  ;;  %v4179_v52 = vld [vmem:[%s4890_s26 + $0x94] sm:$0xf] }
  0xce   : > { %2450 = vmatpush.bf16.msra.mxu2 %v3266_v42  ;;  %v3186_v42 = vor.u32 %v4181_v26, %v3183_v27  ;;  %v3178_v12 = vor.u32 %v4179_v52, %v3175_v59  ;;  %v4271_v26 = vld [vmem:[%s4890_s26 + $0x374] sm:$0xf]  ;;  %v3543_v27 = vld [vmem:[%s4890_s26 + $0x378] sm:$0xf0] }
  0xcf   : > { %2469 = vmatpush.bf16.msra.mxu3 %v3330_v55  ;;  %v5299_v55 = vor.u32 %v4159_v11, %v3085_v10  ;;  %v4161_v10 = vld [vmem:[%s4890_s26 + $0x4] sm:$0xf]  ;;  %v3103_v11 = vld [vmem:[%s4890_s26 + $0x8] sm:$0xf0]  ;;  %v4255_v32 = vld [vmem:[%s4890_s26 + $0x2f4] sm:$0xf] }
  0xd0   : > { %2413 = vmatpush.bf16.msra.mxu0 %v3130_v3  ;;  %v3242_v3 = vor.u32 %v4195_v38, %v3239_v41  ;;  %2365 = vmatmul.bf16.gmra.mxu1 %v5301_v58  ;;  %v3106_v34 = vor.u32 %v4161_v10, %v3103_v11  ;;  %v3298_v41 = vor.u32 %v4209_v20, %v3295_v21  ;;  %v4235_v20 = vld [vmem:[%s4890_s26 + $0x254] sm:$0xf]  ;;  %v3399_v21 = vld [vmem:[%s4890_s26 + $0x258] sm:$0xf0] }
  0xd1   : > { %2432 = vmatpush.bf16.msra.mxu1 %v3194_v16  ;;  %v4177_v16 = vld [vmem:[%s4890_s26 + $0x84] sm:$0xf]  ;;  %2346 = vmatmul.bf16.gmra.mxu0 %v5299_v55  ;;  %v3482_v52 = vor.u32 %v4255_v32, %v3479_v35  ;;  %v3538_v10 = vor.u32 %v4269_v47, %v3535_v49  ;;  %v3410_v11 = vor.u32 %v4237_v60, %v3407_v61  ;;  %v3591_v32 = vld [vmem:[%s4890_s26 + $0x3d8] sm:$0xf0]  ;;  %v3391_v47 = vld [vmem:[%s4890_s26 + $0x248] sm:$0xf0] }
  0xd2   : > { %2451 = vmatpush.bf16.msra.mxu2 %v3258_v2  ;;  %v4193_v2 = vld [vmem:[%s4890_s26 + $0x104] sm:$0xf]  ;;  %2403 = vmatmul.bf16.gmra.mxu3 %v5308_v63  ;;  %v3583_v60 = vld [vmem:[%s4890_s26 + $0x3c8] sm:$0xf0] }
  0xd3   : > { %2470 = vmatpush.bf16.msra.mxu3 %v3322_v19  ;;  %v3167_v19 = vld [vmem:[%s4890_s26 + $0x88] sm:$0xf0]  ;;  %2384 = vmatmul.bf16.gmra.mxu2 %v5306_v62  ;;  %v3234_v33 = vor.u32 %v4193_v2, %v3231_v7  ;;  %v4253_v2 = vld [vmem:[%s4890_s26 + $0x2e4] sm:$0xf] }
  0xd4   : > { %2414 = vmatpush.bf16.msra.mxu0 %v3122_v37  ;;  %v3607_v37 = vld [vmem:[%s4890_s26 + $0x3f8] sm:$0xf0]  ;;  %v3170_v38 = vor.u32 %v4177_v16, %v3167_v19  ;;  %v3599_v7 = vld [vmem:[%s4890_s26 + $0x3e8] sm:$0xf0]  ;;  %v4267_v16 = vld [vmem:[%s4890_s26 + $0x354] sm:$0xf] }
  0xd5   : > { %2433 = vmatpush.bf16.msra.mxu1 %v3186_v42  ;;  %v3546_v42 = vor.u32 %v4271_v26, %v3543_v27  ;;  %v3527_v19 = vld [vmem:[%s4890_s26 + $0x358] sm:$0xf0]  ;;  %v4251_v26 = vld [vmem:[%s4890_s26 + $0x2d4] sm:$0xf]  ;;  %v4249_v49 = vld [vmem:[%s4890_s26 + $0x2c4] sm:$0xf] }
  0xd6   : > { %2452 = vmatpush.bf16.msra.mxu2 %v3250_v36  ;;  %v4287_v36 = vld [vmem:[%s4890_s26 + $0x3f4] sm:$0xf]  ;;  %v3530_v35 = vor.u32 %v4267_v16, %v3527_v19  ;;  %v3447_v16 = vld [vmem:[%s4890_s26 + $0x2b8] sm:$0xf0] }
  0xd7   : > { %2471 = vmatpush.bf16.msra.mxu3 %v3314_v43  ;;  %v3418_v43 = vor.u32 %v4239_v30, %v3415_v31  ;;  %v3610_v59 = vor.u32 %v4287_v36, %v3607_v37  ;;  %v3463_v30 = vld [vmem:[%s4890_s26 + $0x2d8] sm:$0xf0]  ;;  %v4283_v31 = vld [vmem:[%s4890_s26 + $0x3d4] sm:$0xf]  ;;  %v3402_v36 = vor.u32 %v4235_v20, %v3399_v21  ;;  %v4265_v37 = vld [vmem:[%s4890_s26 + $0x344] sm:$0xf] }
  0xd8   : > { %2415 = vmatpush.bf16.msra.mxu0 %v3114_v4  ;;  %v4285_v4 = vld [vmem:[%s4890_s26 + $0x3e4] sm:$0xf]  ;;  %v4279_v19 = vld [vmem:[%s4890_s26 + $0x3b4] sm:$0xf]  ;;  %v3575_v20 = vld [vmem:[%s4890_s26 + $0x3b8] sm:$0xf0] }
  0xd9   : > { %2434 = vmatpush.bf16.msra.mxu1 %v3178_v12 }
  0xda   : > { %2453 = vmatpush.bf16.msra.mxu2 %v3242_v3  ;;  %v3471_v3 = vld [vmem:[%s4890_s26 + $0x2e8] sm:$0xf0] }
  0xdb   : > { %2472 = vmatpush.bf16.msra.mxu3 %v3306_v15  ;;  %v3474_v12 = vor.u32 %v4253_v2, %v3471_v3  ;;  %v3602_v15 = vor.u32 %v4285_v4, %v3599_v7  ;;  %v3511_v3 = vld [vmem:[%s4890_s26 + $0x338] sm:$0xf0] }
  0xdc   : > { %2416 = vmatpush.bf16.msra.mxu0 %v3106_v34  ;;  %v2114_v27 = vpop.f32.mrf.mxu0 }
  0xdd   : > { %2435 = vmatpush.bf16.msra.mxu1 %v3170_v38  ;;  %v3519_v38 = vld [vmem:[%s4890_s26 + $0x348] sm:$0xf0] }
  0xde   : > { %2454 = vmatpush.bf16.msra.mxu2 %v3234_v33  ;;  %v2133_v33 = vpop.f32.mrf.mxu1  ;;  %v3522_v61 = vor.u32 %v4265_v37, %v3519_v38  ;;  %v3375_v37 = vld [vmem:[%s4890_s26 + $0x228] sm:$0xf0]  ;;  %v4245_v38 = vld [vmem:[%s4890_s26 + $0x2a4] sm:$0xf] }
  0xdf   : > { %2473 = vmatpush.bf16.msra.mxu3 %v3298_v41  ;;  %v2134_v34 = vadd.f32 %v2133_v33, %v2114_v27  ;;  %v3466_v41 = vor.u32 %v4251_v26, %v3463_v30  ;;  %v3503_v33 = vld [vmem:[%s4890_s26 + $0x328] sm:$0xf0] }
  0xe0   : > { %2485 = vmatpush.bf16.msrb.mxu0 %v3418_v43  ;;  %v4233_v43 = vld [vmem:[%s4890_s26 + $0x244] sm:$0xf]  ;;  %2436 = vmatmul.bf16.vlgmr.msra.gmra.mxu1 %v4982_v53 }
  0xe1   : > { %2504 = vmatpush.bf16.msrb.mxu1 %v3482_v52  ;;  %2417 = vmatmul.bf16.vlgmr.msra.gmra.mxu0 %v4977_v48  ;;  %v3455_v52 = vld [vmem:[%s4890_s26 + $0x2c8] sm:$0xf0]  ;;  %v3394_v2 = vor.u32 %v4233_v43, %v3391_v47  ;;  %v4263_v48 = vld [vmem:[%s4890_s26 + $0x334] sm:$0xf] }
  0xe2   : > { %2523 = vmatpush.bf16.msrb.mxu2 %v3546_v42  ;;  %v3594_v42 = vor.u32 %v4283_v31, %v3591_v32  ;;  %2474 = vmatmul.bf16.vlgmr.msra.gmra.mxu3 %v4988_v57  ;;  %v3458_v4 = vor.u32 %v4249_v49, %v3455_v52  ;;  %v3514_v26 = vor.u32 %v4263_v48, %v3511_v3  ;;  %v4261_v32 = vld [vmem:[%s4890_s26 + $0x324] sm:$0xf]  ;;  %v3567_v43 = vld [vmem:[%s4890_s26 + $0x3a8] sm:$0xf0]  ;;  %v4259_v52 = vld [vmem:[%s4890_s26 + $0x314] sm:$0xf] }
  0xe3   : > { %2542 = vmatpush.bf16.msrb.mxu3 %v3610_v59  ;;  %v4281_v59 = vld [vmem:[%s4890_s26 + $0x3c4] sm:$0xf]  ;;  %2455 = vmatmul.bf16.vlgmr.msra.gmra.mxu2 %v4984_v54  ;;  %v4247_v54 = vld [vmem:[%s4890_s26 + $0x2b4] sm:$0xf]  ;;  %v3506_v47 = vor.u32 %v4261_v32, %v3503_v33  ;;  %v3367_v3 = vld [vmem:[%s4890_s26 + $0x218] sm:$0xf0] }
  0xe4   : > { %2486 = vmatpush.bf16.msrb.mxu0 %v3410_v11  ;;  %v2152_v53 = vpop.f32.mrf.mxu2  ;;  %v3586_v7 = vor.u32 %v4281_v59, %v3583_v60  ;;  %v3383_v11 = vld [vmem:[%s4890_s26 + $0x238] sm:$0xf0]  ;;  %v4227_v48 = vld [vmem:[%s4890_s26 + $0x214] sm:$0xf] }
  0xe5   : > { %2505 = vmatpush.bf16.msrb.mxu1 %v3474_v12  ;;  %v2153_v57 = vadd.f32 %v2152_v53, %v2134_v34  ;;  %v2171_v12 = vpop.f32.mrf.mxu3  ;;  %v3450_v34 = vor.u32 %v4247_v54, %v3447_v16  ;;  %v3495_v59 = vld [vmem:[%s4890_s26 + $0x318] sm:$0xf0]  ;;  %v4243_v53 = vld [vmem:[%s4890_s26 + $0x294] sm:$0xf]  ;;  %v4257_v16 = vld [vmem:[%s4890_s26 + $0x304] sm:$0xf] }
  0xe6   : > { %2524 = vmatpush.bf16.msrb.mxu2 %v3538_v10  ;;  %v4231_v10 = vld [vmem:[%s4890_s26 + $0x234] sm:$0xf]  ;;  %v2135_v21 = vpop.f32.mrf.mxu1 }
  0xe7   : > { %2543 = vmatpush.bf16.msrb.mxu3 %v3602_v15  ;;  %v2116_v15 = vpop.f32.mrf.mxu0  ;;  %v5366_v27 = vadd.f32 %v2171_v12, %v2153_v57  ;;  %v3386_v31 = vor.u32 %v4231_v10, %v3383_v11  ;;  %v3431_v11 = vld [vmem:[%s4890_s26 + $0x298] sm:$0xf0]  ;;  %v4275_v54 = vld [vmem:[%s4890_s26 + $0x394] sm:$0xf] }
  0xe8   : > { %2487 = vmatpush.bf16.msrb.mxu0 %v3402_v36  ;;  %v2136_v30 = vadd.f32 %v2135_v21, %v2116_v15  ;;  %v4229_v36 = vld [vmem:[%s4890_s26 + $0x224] sm:$0xf]  ;;  %v3559_v57 = vld [vmem:[%s4890_s26 + $0x398] sm:$0xf0]  ;;  %v3498_v15 = vor.u32 %v4259_v52, %v3495_v59  ;;  %v3370_v21 = vor.u32 %v4227_v48, %v3367_v3  ;;  %v3434_v32 = vor.u32 %v4243_v53, %v3431_v11  ;;  %v4351_v59 = vld [vmem:[%s4890_s26 + $0x5f4] sm:$0xf] }
  0xe9   : > { %2506 = vmatpush.bf16.msrb.mxu1 %v3466_v41  ;;  %v3439_v41 = vld [vmem:[%s4890_s26 + $0x2a8] sm:$0xf0]  ;;  %v3378_v49 = vor.u32 %v4229_v36, %v3375_v37  ;;  %v3562_v33 = vor.u32 %v4275_v54, %v3559_v57  ;;  %v4273_v36 = vld [vmem:[%s4890_s26 + $0x384] sm:$0xf] }
  0xea   : > { %2525 = vmatpush.bf16.msrb.mxu2 %v3530_v35  ;;  %v3578_v35 = vor.u32 %v4279_v19, %v3575_v20  ;;  %v3551_v37 = vld [vmem:[%s4890_s26 + $0x388] sm:$0xf0]  ;;  %v4301_v57 = vld [vmem:[%s4890_s26 + $0x464] sm:$0xf] }
  0xeb   : > { %2544 = vmatpush.bf16.msrb.mxu3 %v3594_v42  ;;  %v4277_v42 = vld [vmem:[%s4890_s26 + $0x3a4] sm:$0xf] }
  0xec   : > { %2488 = vmatpush.bf16.msrb.mxu0 %v3394_v2  ;;  %v2154_v60 = vpop.f32.mrf.mxu2  ;;  %v3570_v2 = vor.u32 %v4277_v42, %v3567_v43  ;;  %v4303_v42 = vld [vmem:[%s4890_s26 + $0x474] sm:$0xf]  ;;  %v3671_v43 = vld [vmem:[%s4890_s26 + $0x478] sm:$0xf0] }
  0xed   : > { %2507 = vmatpush.bf16.msrb.mxu1 %v3458_v4  ;;  %v2155_v4 = vadd.f32 %v2154_v60, %v2136_v30  ;;  %v4225_v30 = vld [vmem:[%s4890_s26 + $0x204] sm:$0xf]  ;;  %v3863_v60 = vld [vmem:[%s4890_s26 + $0x5f8] sm:$0xf0]  ;;  %v3674_v53 = vor.u32 %v4303_v42, %v3671_v43  ;;  %v4315_v42 = vld [vmem:[%s4890_s26 + $0x4d4] sm:$0xf] }
  0xee   : > { %2526 = vmatpush.bf16.msrb.mxu2 %v3522_v61  ;;  %v3442_v61 = vor.u32 %v4245_v38, %v3439_v41  ;;  %v2138_v12 = vpop.f32.mrf.mxu1  ;;  %v4335_v38 = vld [vmem:[%s4890_s26 + $0x574] sm:$0xf]  ;;  %v3799_v41 = vld [vmem:[%s4890_s26 + $0x578] sm:$0xf0]  ;;  %v3866_v54 = vor.u32 %v4351_v59, %v3863_v60 }
  0xef   : > { %2545 = vmatpush.bf16.msrb.mxu3 %v3586_v7  ;;  %v2173_v7 = vpop.f32.mrf.mxu3  ;;  %v2119_v10 = vpop.f32.mrf.mxu0  ;;  %v3802_v3 = vor.u32 %v4335_v38, %v3799_v41  ;;  %v4299_v38 = vld [vmem:[%s4890_s26 + $0x454] sm:$0xf]  ;;  %v3655_v41 = vld [vmem:[%s4890_s26 + $0x458] sm:$0xf0] }
  0xf0   : > { %2489 = vmatpush.bf16.msrb.mxu0 %v3386_v31  ;;  %v5385_v19 = vadd.f32 %v2173_v7, %v2155_v4  ;;  %v2139_v20 = vadd.f32 %v2138_v12, %v2119_v10  ;;  %v3359_v31 = vld [vmem:[%s4890_s26 + $0x208] sm:$0xf0]  ;;  %2441 = vmatmul.bf16.gmra.mxu1 %v5026_v50  ;;  %v4333_v4 = vld [vmem:[%s4890_s26 + $0x564] sm:$0xf] }
  0xf1   : > { %2508 = vmatpush.bf16.msrb.mxu1 %v3450_v34  ;;  %v4241_v34 = vld [vmem:[%s4890_s26 + $0x284] sm:$0xf]  ;;  %2422 = vmatmul.bf16.gmra.mxu0 %v5021_v44  ;;  %v3362_v52 = vor.u32 %v4225_v30, %v3359_v31  ;;  %v3735_v44 = vld [vmem:[%s4890_s26 + $0x4f8] sm:$0xf0]  ;;  %v3791_v7 = vld [vmem:[%s4890_s26 + $0x568] sm:$0xf0] }
  0xf2   : > { %2527 = vmatpush.bf16.msrb.mxu2 %v3514_v26  ;;  %v3487_v26 = vld [vmem:[%s4890_s26 + $0x308] sm:$0xf0]  ;;  %2479 = vmatmul.bf16.gmra.mxu3 %v5032_v56  ;;  %v3554_v56 = vor.u32 %v4273_v36, %v3551_v37  ;;  %v3794_v31 = vor.u32 %v4333_v4, %v3791_v7  ;;  %v3783_v36 = vld [vmem:[%s4890_s26 + $0x558] sm:$0xf0]  ;;  %v4313_v7 = vld [vmem:[%s4890_s26 + $0x4c4] sm:$0xf] }
  0xf3   : > { %2546 = vmatpush.bf16.msrb.mxu3 %v3578_v35  ;;  %v3423_v35 = vld [vmem:[%s4890_s26 + $0x288] sm:$0xf0]  ;;  %2460 = vmatmul.bf16.gmra.mxu2 %v5028_v51 }
  0xf4   : > { %2490 = vmatpush.bf16.msrb.mxu0 %v3378_v49  ;;  %v3490_v49 = vor.u32 %v4257_v16, %v3487_v26  ;;  %v2157_v50 = vpop.f32.mrf.mxu2  ;;  %v3426_v51 = vor.u32 %v4241_v34, %v3423_v35  ;;  %v3663_v12 = vld [vmem:[%s4890_s26 + $0x468] sm:$0xf0]  ;;  %v4349_v26 = vld [vmem:[%s4890_s26 + $0x5e4] sm:$0xf]  ;;  %v4331_v35 = vld [vmem:[%s4890_s26 + $0x554] sm:$0xf] }
  0xf5   : > { %2509 = vmatpush.bf16.msrb.mxu1 %v3442_v61  ;;  %v2158_v61 = vadd.f32 %v2157_v50, %v2139_v20  ;;  %v3727_v20 = vld [vmem:[%s4890_s26 + $0x4e8] sm:$0xf0] }
  0xf6   : > { %2528 = vmatpush.bf16.msrb.mxu2 %v3506_v47  ;;  %v4319_v47 = vld [vmem:[%s4890_s26 + $0x4f4] sm:$0xf]  ;;  %v2140_v10 = vpop.f32.mrf.mxu1  ;;  %v3855_v30 = vld [vmem:[%s4890_s26 + $0x5e8] sm:$0xf0] }
  0xf7   : > { %2547 = vmatpush.bf16.msrb.mxu3 %v3570_v2  ;;  %v2176_v2 = vpop.f32.mrf.mxu3  ;;  %v2121_v48 = vpop.f32.mrf.mxu0  ;;  %v3738_v11 = vor.u32 %v4319_v47, %v3735_v44  ;;  %v3858_v34 = vor.u32 %v4349_v26, %v3855_v30  ;;  %v3847_v44 = vld [vmem:[%s4890_s26 + $0x5d8] sm:$0xf0]  ;;  %v3647_v4 = vld [vmem:[%s4890_s26 + $0x448] sm:$0xf0] }
  0xf8   : > { %2491 = vmatpush.bf16.msrb.mxu0 %v3370_v21  ;;  %v5411_v16 = vadd.f32 %v2176_v2, %v2158_v61  ;;  %v2141_v21 = vadd.f32 %v2140_v10, %v2121_v48  ;;  %v4329_v61 = vld [vmem:[%s4890_s26 + $0x544] sm:$0xf]  ;;  %v3775_v2 = vld [vmem:[%s4890_s26 + $0x548] sm:$0xf0]  ;;  %v3639_v26 = vld [vmem:[%s4890_s26 + $0x438] sm:$0xf0] }
  0xf9   : > { %2510 = vmatpush.bf16.msrb.mxu1 %v3434_v32  ;;  %v3666_v32 = vor.u32 %v4301_v57, %v3663_v12  ;;  %v3711_v10 = vld [vmem:[%s4890_s26 + $0x4c8] sm:$0xf0]  ;;  %v3778_v57 = vor.u32 %v4329_v61, %v3775_v2 }
  0xfa   : > { %2529 = vmatpush.bf16.msrb.mxu2 %v3498_v15  ;;  %v4317_v15 = vld [vmem:[%s4890_s26 + $0x4e4] sm:$0xf] }
  0xfb   : > { %2548 = vmatpush.bf16.msrb.mxu3 %v3562_v33  ;;  %v3730_v33 = vor.u32 %v4317_v15, %v3727_v20  ;;  %v3767_v15 = vld [vmem:[%s4890_s26 + $0x538] sm:$0xf0]  ;;  %v4295_v20 = vld [vmem:[%s4890_s26 + $0x434] sm:$0xf] }
  0xfc   : > { %2492 = vmatpush.bf16.msrb.mxu0 %v3362_v52  ;;  %v2159_v37 = vpop.f32.mrf.mxu2  ;;  %v4347_v52 = vld [vmem:[%s4890_s26 + $0x5d4] sm:$0xf] }
  0xfd   : > { %2511 = vmatpush.bf16.msrb.mxu1 %v3426_v51  ;;  %v2160_v43 = vadd.f32 %v2159_v37, %v2141_v21  ;;  %v3786_v51 = vor.u32 %v4331_v35, %v3783_v36  ;;  %v3642_v37 = vor.u32 %v4295_v20, %v3639_v26  ;;  %v4321_v20 = vld [vmem:[%s4890_s26 + $0x504] sm:$0xf] }
  0xfe   : > { %2530 = vmatpush.bf16.msrb.mxu2 %v3490_v49  ;;  %v3719_v49 = vld [vmem:[%s4890_s26 + $0x4d8] sm:$0xf0]  ;;  %v5426_v60 = vpop.f32.mrf.mxu1 }
  0xff   : > { %2549 = vmatpush.bf16.msrb.mxu3 %v3554_v56  ;;  %v2178_v47 = vpop.f32.mrf.mxu3  ;;  %v5424_v59 = vpop.f32.mrf.mxu0  ;;  %v3658_v56 = vor.u32 %v4299_v38, %v3655_v41  ;;  %v3722_v48 = vor.u32 %v4315_v42, %v3719_v49  ;;  %v4325_v38 = vld [vmem:[%s4890_s26 + $0x524] sm:$0xf]  ;;  %v3759_v41 = vld [vmem:[%s4890_s26 + $0x528] sm:$0xf0] }
 0x100   : > { %2561 = vmatpush.bf16.msra.mxu0 %v3674_v53  ;;  %v5428_v50 = vadd.f32 %v2178_v47, %v2160_v43  ;;  %v4297_v53 = vld [vmem:[%s4890_s26 + $0x444] sm:$0xf]  ;;  %2512 = vmatmul.bf16.vlgmr.msrb.gmra.mxu1 %v5075_v1  ;;  %v3714_v1 = vor.u32 %v4313_v7, %v3711_v10  ;;  %v3631_v49 = vld [vmem:[%s4890_s26 + $0x428] sm:$0xf0]  ;;  %v3762_v61 = vor.u32 %v4325_v38, %v3759_v41  ;;  %v4291_v7 = vld [vmem:[%s4890_s26 + $0x414] sm:$0xf] }
 0x101   : > { %2580 = vmatpush.bf16.msra.mxu1 %v3738_v11  ;;  %2493 = vmatmul.bf16.vlgmr.msrb.gmra.mxu0 %v5073_v0  ;;  %v4345_v11 = vld [vmem:[%s4890_s26 + $0x5c4] sm:$0xf]  ;;  %v3650_v12 = vor.u32 %v4297_v53, %v3647_v4  ;;  %v4327_v0 = vld [vmem:[%s4890_s26 + $0x534] sm:$0xf]  ;;  %v3623_v10 = vld [vmem:[%s4890_s26 + $0x418] sm:$0xf0] }
 0x102   : > { %2599 = vmatpush.bf16.msra.mxu2 %v3802_v3  ;;  %v3850_v3 = vor.u32 %v4347_v52, %v3847_v44  ;;  %2550 = vmatmul.bf16.vlgmr.msrb.gmra.mxu3 %v5082_v6  ;;  %v3770_v36 = vor.u32 %v4327_v0, %v3767_v15  ;;  %v4293_v47 = vld [vmem:[%s4890_s26 + $0x424] sm:$0xf]  ;;  %v3695_v44 = vld [vmem:[%s4890_s26 + $0x4a8] sm:$0xf0]  ;;  %v4339_v0 = vld [vmem:[%s4890_s26 + $0x594] sm:$0xf] }
 0x103   : > { %2618 = vmatpush.bf16.msra.mxu3 %v3866_v54  ;;  %v3839_v54 = vld [vmem:[%s4890_s26 + $0x5c8] sm:$0xf0]  ;;  %2531 = vmatmul.bf16.vlgmr.msrb.gmra.mxu2 %v5080_v5  ;;  %v4311_v5 = vld [vmem:[%s4890_s26 + $0x4b4] sm:$0xf]  ;;  %v4309_v52 = vld [vmem:[%s4890_s26 + $0x4a4] sm:$0xf]  ;;  %v3634_v2 = vor.u32 %v4293_v47, %v3631_v49 }
 0x104   : > { %2562 = vmatpush.bf16.msra.mxu0 %v3666_v32  ;;  %v3842_v21 = vor.u32 %v4345_v11, %v3839_v54  ;;  %v5447_v30 = vpop.f32.mrf.mxu2  ;;  %v4343_v32 = vld [vmem:[%s4890_s26 + $0x5b4] sm:$0xf]  ;;  %v3698_v53 = vor.u32 %v4309_v52, %v3695_v44  ;;  %v3815_v15 = vld [vmem:[%s4890_s26 + $0x598] sm:$0xf0]  ;;  %v4305_v38 = vld [vmem:[%s4890_s26 + $0x484] sm:$0xf] }
 0x105   : > { %2581 = vmatpush.bf16.msra.mxu1 %v3730_v33  ;;  %v3831_v33 = vld [vmem:[%s4890_s26 + $0x5b8] sm:$0xf0]  ;;  %v4307_v11 = vld [vmem:[%s4890_s26 + $0x494] sm:$0xf]  ;;  %v3679_v41 = vld [vmem:[%s4890_s26 + $0x488] sm:$0xf0] }
 0x106   : > { %2600 = vmatpush.bf16.msra.mxu2 %v3794_v31  ;;  %v3703_v31 = vld [vmem:[%s4890_s26 + $0x4b8] sm:$0xf0]  ;;  %v5456_v35 = vpop.f32.mrf.mxu1  ;;  %v3834_v43 = vor.u32 %v4343_v32, %v3831_v33  ;;  %v4289_v32 = vld [vmem:[%s4890_s26 + $0x404] sm:$0xf]  ;;  %v3615_v33 = vld [vmem:[%s4890_s26 + $0x408] sm:$0xf0] }
 0x107   : > { %2619 = vmatpush.bf16.msra.mxu3 %v3858_v34  ;;  %v5449_v6 = vpop.f32.mrf.mxu3  ;;  %v5454_v34 = vpop.f32.mrf.mxu0  ;;  %v3706_v42 = vor.u32 %v4311_v5, %v3703_v31  ;;  %v3626_v5 = vor.u32 %v4291_v7, %v3623_v10  ;;  %v3743_v31 = vld [vmem:[%s4890_s26 + $0x508] sm:$0xf0]  ;;  %v4399_v47 = vld [vmem:[%s4890_s26 + $0x774] sm:$0xf]  ;;  %v4055_v49 = vld [vmem:[%s4890_s26 + $0x778] sm:$0xf0] }
 0x108   : > { %2563 = vmatpush.bf16.msra.mxu0 %v3658_v56  ;;  %v3823_v56 = vld [vmem:[%s4890_s26 + $0x5a8] sm:$0xf0]  ;;  %v4367_v52 = vld [vmem:[%s4890_s26 + $0x674] sm:$0xf]  ;;  %v3927_v44 = vld [vmem:[%s4890_s26 + $0x678] sm:$0xf0] }
 0x109   : > { %2582 = vmatpush.bf16.msra.mxu1 %v3722_v48  ;;  %v4323_v48 = vld [vmem:[%s4890_s26 + $0x514] sm:$0xf]  ;;  %v4397_v7 = vld [vmem:[%s4890_s26 + $0x764] sm:$0xf]  ;;  %v4047_v10 = vld [vmem:[%s4890_s26 + $0x768] sm:$0xf0] }
 0x10a   : > { %2601 = vmatpush.bf16.msra.mxu2 %v3786_v51  ;;  %v4341_v51 = vld [vmem:[%s4890_s26 + $0x5a4] sm:$0xf] }
 0x10b   : > { %2620 = vmatpush.bf16.msra.mxu3 %v3850_v3  ;;  %v3751_v3 = vld [vmem:[%s4890_s26 + $0x518] sm:$0xf0]  ;;  %v3826_v4 = vor.u32 %v4341_v51, %v3823_v56  ;;  %v4383_v51 = vld [vmem:[%s4890_s26 + $0x6f4] sm:$0xf]  ;;  %v3746_v56 = vor.u32 %v4321_v20, %v3743_v31  ;;  %v4365_v20 = vld [vmem:[%s4890_s26 + $0x664] sm:$0xf] }
 0x10c   : > { %2564 = vmatpush.bf16.msra.mxu0 %v3650_v12  ;;  %v5471_v54 = vpop.f32.mrf.mxu2  ;;  %v3687_v12 = vld [vmem:[%s4890_s26 + $0x498] sm:$0xf0]  ;;  %v3754_v26 = vor.u32 %v4323_v48, %v3751_v3  ;;  %v3983_v31 = vld [vmem:[%s4890_s26 + $0x6e8] sm:$0xf0] }
 0x10d   : > { %2583 = vmatpush.bf16.msra.mxu1 %v3714_v1 }
 0x10e   : > { %2602 = vmatpush.bf16.msra.mxu2 %v3778_v57 }
 0x10f   : > { %2621 = vmatpush.bf16.msra.mxu3 %v3842_v21  ;;  %v5473_v57 = vpop.f32.mrf.mxu3  ;;  %v5478_v1 = vpop.f32.mrf.mxu0 }
 0x110   : > { %2565 = vmatpush.bf16.msra.mxu0 %v3642_v37  ;;  %v5480_v21 = vpop.f32.mrf.mxu1  ;;  %v3818_v37 = vor.u32 %v4339_v0, %v3815_v15  ;;  %2517 = vmatmul.bf16.gmra.mxu1 %v5119_v9  ;;  %v4119_v9 = vld [vmem:[%s4890_s26 + $0x7f8] sm:$0xf0] }
 0x111   : > { %2584 = vmatpush.bf16.msra.mxu1 %v3706_v42  ;;  %v4337_v42 = vld [vmem:[%s4890_s26 + $0x584] sm:$0xf]  ;;  %2498 = vmatmul.bf16.gmra.mxu0 %v5117_v8  ;;  %v3991_v8 = vld [vmem:[%s4890_s26 + $0x6f8] sm:$0xf0] }
 0x112   : > { %2603 = vmatpush.bf16.msra.mxu2 %v3770_v36  ;;  %v3690_v36 = vor.u32 %v4307_v11, %v3687_v12  ;;  %2555 = vmatmul.bf16.gmra.mxu3 %v5126_v14  ;;  %v3994_v0 = vor.u32 %v4383_v51, %v3991_v8  ;;  %v4103_v8 = vld [vmem:[%s4890_s26 + $0x7d8] sm:$0xf0] }
 0x113   : > { %2622 = vmatpush.bf16.msra.mxu3 %v3834_v43  ;;  %v3807_v43 = vld [vmem:[%s4890_s26 + $0x588] sm:$0xf0]  ;;  %2536 = vmatmul.bf16.gmra.mxu2 %v5124_v13  ;;  %v3682_v13 = vor.u32 %v4305_v38, %v3679_v41 }
 0x114   : > { %2566 = vmatpush.bf16.msra.mxu0 %v3634_v2  ;;  %v4415_v2 = vld [vmem:[%s4890_s26 + $0x7f4] sm:$0xf]  ;;  %v3810_v48 = vor.u32 %v4337_v42, %v3807_v43  ;;  %v5502_v14 = vpop.f32.mrf.mxu2  ;;  %v4039_v43 = vld [vmem:[%s4890_s26 + $0x758] sm:$0xf0] }
 0x115   : > { %2585 = vmatpush.bf16.msra.mxu1 %v3698_v53  ;;  %v4058_v53 = vor.u32 %v4399_v47, %v4055_v49  ;;  %v4122_v15 = vor.u32 %v4415_v2, %v4119_v9  ;;  %v4395_v42 = vld [vmem:[%s4890_s26 + $0x754] sm:$0xf]  ;;  %v3911_v49 = vld [vmem:[%s4890_s26 + $0x658] sm:$0xf0] }
 0x116   : > { %2604 = vmatpush.bf16.msra.mxu2 %v3762_v61  ;;  %v3618_v61 = vor.u32 %v4289_v32, %v3615_v33  ;;  %v4413_v32 = vld [vmem:[%s4890_s26 + $0x7e4] sm:$0xf]  ;;  %v4111_v33 = vld [vmem:[%s4890_s26 + $0x7e8] sm:$0xf0]  ;;  %v4363_v47 = vld [vmem:[%s4890_s26 + $0x654] sm:$0xf] }
 0x117   : > { %2623 = vmatpush.bf16.msra.mxu3 %v3826_v4  ;;  %v5504_v3 = vpop.f32.mrf.mxu3  ;;  %v3930_v4 = vor.u32 %v4367_v52, %v3927_v44  ;;  %v5508_v11 = vpop.f32.mrf.mxu0  ;;  %v4114_v41 = vor.u32 %v4413_v32, %v4111_v33  ;;  %v4379_v52 = vld [vmem:[%s4890_s26 + $0x6d4] sm:$0xf] }
 0x118   : > { %2567 = vmatpush.bf16.msra.mxu0 %v3626_v5  ;;  %v5510_v12 = vpop.f32.mrf.mxu1  ;;  %v4381_v5 = vld [vmem:[%s4890_s26 + $0x6e4] sm:$0xf] }
 0x119   : > { %2586 = vmatpush.bf16.msra.mxu1 %v3690_v36  ;;  %v4050_v36 = vor.u32 %v4397_v7, %v4047_v10  ;;  %v3986_v38 = vor.u32 %v4381_v5, %v3983_v31  ;;  %v4409_v5 = vld [vmem:[%s4890_s26 + $0x7c4] sm:$0xf]  ;;  %v4095_v31 = vld [vmem:[%s4890_s26 + $0x7c8] sm:$0xf0] }
 0x11a   : > { %2605 = vmatpush.bf16.msra.mxu2 %v3754_v26  ;;  %v3919_v26 = vld [vmem:[%s4890_s26 + $0x668] sm:$0xf0] }
 0x11b   : > { %2624 = vmatpush.bf16.msra.mxu3 %v3818_v37  ;;  %v3922_v37 = vor.u32 %v4365_v20, %v3919_v26  ;;  %v4377_v20 = vld [vmem:[%s4890_s26 + $0x6c4] sm:$0xf]  ;;  %v3967_v26 = vld [vmem:[%s4890_s26 + $0x6c8] sm:$0xf0] }
 0x11c   : > { %2568 = vmatpush.bf16.msra.mxu0 %v3618_v61  ;;  %v5523_v44 = vpop.f32.mrf.mxu2  ;;  %v4411_v61 = vld [vmem:[%s4890_s26 + $0x7d4] sm:$0xf] }
 0x11d   : > { %2587 = vmatpush.bf16.msra.mxu1 %v3682_v13  ;;  %v4042_v13 = vor.u32 %v4395_v42, %v4039_v43  ;;  %v4106_v10 = vor.u32 %v4411_v61, %v4103_v8  ;;  %v3959_v43 = vld [vmem:[%s4890_s26 + $0x6b8] sm:$0xf0] }
 0x11e   : > { %2606 = vmatpush.bf16.msra.mxu2 %v3746_v56  ;;  %v3975_v56 = vld [vmem:[%s4890_s26 + $0x6d8] sm:$0xf0] }
 0x11f   : > { %2625 = vmatpush.bf16.msra.mxu3 %v3810_v48  ;;  %v5525_v51 = vpop.f32.mrf.mxu3  ;;  %v5530_v2 = vpop.f32.mrf.mxu0  ;;  %v3914_v48 = vor.u32 %v4363_v47, %v3911_v49  ;;  %v3978_v7 = vor.u32 %v4379_v52, %v3975_v56  ;;  %v4407_v47 = vld [vmem:[%s4890_s26 + $0x7b4] sm:$0xf]  ;;  %v4087_v49 = vld [vmem:[%s4890_s26 + $0x7b8] sm:$0xf0] }
 0x120   : > { %2637 = vmatpush.bf16.msrb.mxu0 %v3930_v4  ;;  %v5532_v9 = vpop.f32.mrf.mxu1  ;;  %v4031_v4 = vld [vmem:[%s4890_s26 + $0x748] sm:$0xf0]  ;;  %2588 = vmatmul.bf16.vlgmr.msra.gmra.mxu1 %v5165_v24  ;;  %v3970_v24 = vor.u32 %v4377_v20, %v3967_v26  ;;  %v4405_v26 = vld [vmem:[%s4890_s26 + $0x7a4] sm:$0xf] }
 0x121   : > { %2656 = vmatpush.bf16.msrb.mxu1 %v3994_v0  ;;  %v4361_v0 = vld [vmem:[%s4890_s26 + $0x644] sm:$0xf]  ;;  %2569 = vmatmul.bf16.vlgmr.msra.gmra.mxu0 %v5163_v23  ;;  %v4391_v23 = vld [vmem:[%s4890_s26 + $0x734] sm:$0xf]  ;;  %v3951_v20 = vld [vmem:[%s4890_s26 + $0x6a8] sm:$0xf0] }
 0x122   : > { %2675 = vmatpush.bf16.msrb.mxu2 %v4058_v53  ;;  %v4393_v53 = vld [vmem:[%s4890_s26 + $0x744] sm:$0xf]  ;;  %2626 = vmatmul.bf16.vlgmr.msra.gmra.mxu3 %v5172_v29 }
 0x123   : > { %2694 = vmatpush.bf16.msrb.mxu3 %v4122_v15  ;;  %v3903_v15 = vld [vmem:[%s4890_s26 + $0x648] sm:$0xf0]  ;;  %2607 = vmatmul.bf16.vlgmr.msra.gmra.mxu2 %v5170_v28  ;;  %v4034_v32 = vor.u32 %v4393_v53, %v4031_v4  ;;  %v4375_v28 = vld [vmem:[%s4890_s26 + $0x6b4] sm:$0xf]  ;;  %v2191_v53 = vadd.f32 %v5424_v59, %v5366_v27 }
 0x124   : > { %2638 = vmatpush.bf16.msrb.mxu0 %v3922_v37  ;;  %v3906_v33 = vor.u32 %v4361_v0, %v3903_v15  ;;  %v4098_v37 = vor.u32 %v4409_v5, %v4095_v31  ;;  %v5551_v42 = vpop.f32.mrf.mxu2  ;;  %v3962_v4 = vor.u32 %v4375_v28, %v3959_v43  ;;  %v3887_v0 = vld [vmem:[%s4890_s26 + $0x628] sm:$0xf0]  ;;  %v4373_v15 = vld [vmem:[%s4890_s26 + $0x6a4] sm:$0xf]  ;;  %v4387_v59 = vld [vmem:[%s4890_s26 + $0x714] sm:$0xf] }
 0x125   : > { %2657 = vmatpush.bf16.msrb.mxu1 %v3986_v38  ;;  %v4359_v38 = vld [vmem:[%s4890_s26 + $0x634] sm:$0xf]  ;;  %v4079_v5 = vld [vmem:[%s4890_s26 + $0x7a8] sm:$0xf0]  ;;  %v3943_v43 = vld [vmem:[%s4890_s26 + $0x698] sm:$0xf0] }
 0x126   : > { %2676 = vmatpush.bf16.msrb.mxu2 %v4050_v36  ;;  %v4023_v36 = vld [vmem:[%s4890_s26 + $0x738] sm:$0xf0] }
 0x127   : > { %2695 = vmatpush.bf16.msrb.mxu3 %v4114_v41  ;;  %v3895_v41 = vld [vmem:[%s4890_s26 + $0x638] sm:$0xf0]  ;;  %v5553_v29 = vpop.f32.mrf.mxu3  ;;  %v5558_v52 = vpop.f32.mrf.mxu0  ;;  %v4026_v61 = vor.u32 %v4391_v23, %v4023_v36  ;;  %v3954_v23 = vor.u32 %v4373_v15, %v3951_v20  ;;  %v4082_v36 = vor.u32 %v4405_v26, %v4079_v5  ;;  %v3871_v15 = vld [vmem:[%s4890_s26 + $0x608] sm:$0xf0]  ;;  %v4369_v20 = vld [vmem:[%s4890_s26 + $0x684] sm:$0xf] }
 0x128   : > { %2639 = vmatpush.bf16.msrb.mxu0 %v3914_v48  ;;  %v5560_v56 = vpop.f32.mrf.mxu1  ;;  %v3898_v8 = vor.u32 %v4359_v38, %v3895_v41  ;;  %v4015_v48 = vld [vmem:[%s4890_s26 + $0x728] sm:$0xf0]  ;;  %v4371_v38 = vld [vmem:[%s4890_s26 + $0x694] sm:$0xf] }
 0x129   : > { %2658 = vmatpush.bf16.msrb.mxu1 %v3978_v7  ;;  %v4090_v7 = vor.u32 %v4407_v47, %v4087_v49  ;;  %v4403_v47 = vld [vmem:[%s4890_s26 + $0x794] sm:$0xf]  ;;  %v4071_v49 = vld [vmem:[%s4890_s26 + $0x798] sm:$0xf0]  ;;  %v4063_v26 = vld [vmem:[%s4890_s26 + $0x788] sm:$0xf0] }
 0x12a   : > { %2677 = vmatpush.bf16.msrb.mxu2 %v4042_v13  ;;  %v4389_v13 = vld [vmem:[%s4890_s26 + $0x724] sm:$0xf] }
 0x12b   : > { %2696 = vmatpush.bf16.msrb.mxu3 %v4106_v10  ;;  %v4357_v10 = vld [vmem:[%s4890_s26 + $0x624] sm:$0xf]  ;;  %v4018_v31 = vor.u32 %v4389_v13, %v4015_v48  ;;  %v2193_v13 = vadd.f32 %v5454_v34, %v5385_v19  ;;  %v3935_v19 = vld [vmem:[%s4890_s26 + $0x688] sm:$0xf0] }
 0x12c   : > { %2640 = vmatpush.bf16.msrb.mxu0 %v3906_v33  ;;  %v3890_v27 = vor.u32 %v4357_v10, %v3887_v0  ;;  %v2210_v33 = vadd.f32 %v5426_v60, %v2191_v53  ;;  %v5578_v41 = vpop.f32.mrf.mxu2  ;;  %v4074_v10 = vor.u32 %v4403_v47, %v4071_v49  ;;  %v4353_v0 = vld [vmem:[%s4890_s26 + $0x604] sm:$0xf] }
 0x12d   : > { %2659 = vmatpush.bf16.msrb.mxu1 %v3970_v24  ;;  %v4355_v24 = vld [vmem:[%s4890_s26 + $0x614] sm:$0xf]  ;;  %v4401_v34 = vld [vmem:[%s4890_s26 + $0x784] sm:$0xf] }
 0x12e   : > { %2678 = vmatpush.bf16.msrb.mxu2 %v4034_v32  ;;  %v4007_v32 = vld [vmem:[%s4890_s26 + $0x718] sm:$0xf0]  ;;  %v2229_v60 = vadd.f32 %v5447_v30, %v2210_v33  ;;  %v3946_v30 = vor.u32 %v4371_v38, %v3943_v43 }
 0x12f   : > { %2697 = vmatpush.bf16.msrb.mxu3 %v4098_v37  ;;  %v3879_v37 = vld [vmem:[%s4890_s26 + $0x618] sm:$0xf0]  ;;  %v5580_v28 = vpop.f32.mrf.mxu3  ;;  %v4010_v48 = vor.u32 %v4387_v59, %v4007_v32  ;;  %v3874_v59 = vor.u32 %v4353_v0, %v3871_v15 }
 0x130   : > { %2641 = vmatpush.bf16.msrb.mxu0 %v3898_v8  ;;  %v5588_v8 = vpop.f32.mrf.mxu1  ;;  %v3882_v53 = vor.u32 %v4355_v24, %v3879_v37  ;;  %2593 = vmatmul.bf16.gmra.mxu1 %v5209_v40  ;;  %v2248_v5 = vadd.f32 %v5449_v6, %v2229_v60  ;;  %v4066_v40 = vor.u32 %v4401_v34, %v4063_v26  ;;  %v5632_v60 = vld [vmem:[%s4900_s11] sm:$0x3] }
 0x131   : > { %2660 = vmatpush.bf16.msrb.mxu1 %v3962_v4  ;;  %v4385_v4 = vld [vmem:[%s4890_s26 + $0x704] sm:$0xf]  ;;  %2574 = vmatmul.bf16.gmra.mxu0 %v5207_v39  ;;  %v3938_v39 = vor.u32 %v4369_v20, %v3935_v19 }
 0x132   : > { %2679 = vmatpush.bf16.msrb.mxu2 %v4026_v61  ;;  %v5586_v61 = vpop.f32.mrf.mxu0  ;;  %2631 = vmatmul.bf16.gmra.mxu3 %v5216_v46  ;;  %v2267_v32 = vadd.f32 %v5530_v2, %v2248_v5  ;;  %v2196_v46 = vadd.f32 %v5478_v1, %v5411_v16 }
 0x133   : > { %2698 = vmatpush.bf16.msrb.mxu3 %v4090_v7  ;;  %v3999_v7 = vld [vmem:[%s4890_s26 + $0x708] sm:$0xf0]  ;;  %2612 = vmatmul.bf16.gmra.mxu2 %v5214_v45 }
 0x134   : > { %2642 = vmatpush.bf16.msrb.mxu0 %v3890_v27  ;;  %v4002_v27 = vor.u32 %v4385_v4, %v3999_v7  ;;  %v2309_v33 = vpop.f32.mrf.mxu2  ;;  %v2215_v37 = vadd.f32 %v5480_v21, %v2196_v46 }
 0x135   : > { %2661 = vmatpush.bf16.msrb.mxu1 %v3954_v23 }
 0x136   : > { %2680 = vmatpush.bf16.msrb.mxu2 %v4018_v31  ;;  %v2212_v31 = vadd.f32 %v5456_v35, %v2193_v13  ;;  %v2286_v35 = vadd.f32 %v5532_v9, %v2267_v32  ;;  %v2234_v47 = vadd.f32 %v5502_v14, %v2215_v37  ;;  %v2198_v9 = vadd.f32 %v5508_v11, %v5428_v50  ;;  %v5627_v14 = vld [vmem:[%s4897_s28] sm:$0x3] }
 0x137   : > { %2699 = vmatpush.bf16.msrb.mxu3 %v4082_v36  ;;  %v2328_v23 = vpop.f32.mrf.mxu3 }
 0x138   : > { %2643 = vmatpush.bf16.msrb.mxu0 %v3882_v53  ;;  %v2231_v6 = vadd.f32 %v5471_v54, %v2212_v31  ;;  %v2292_v45 = vpop.f32.mrf.mxu1  ;;  %v2305_v24 = vadd.f32 %v5551_v42, %v2286_v35  ;;  %v2253_v21 = vadd.f32 %v5504_v3, %v2234_v47 }
 0x139   : > { %2662 = vmatpush.bf16.msrb.mxu1 %v3946_v30 }
 0x13a   : > { %2681 = vmatpush.bf16.msrb.mxu2 %v4010_v48  ;;  %v2273_v36 = vpop.f32.mrf.mxu0  ;;  %v2250_v2 = vadd.f32 %v5473_v57, %v2231_v6  ;;  %v2324_v49 = vadd.f32 %v5553_v29, %v2305_v24  ;;  %v2217_v29 = vadd.f32 %v5510_v12, %v2198_v9  ;;  %v2272_v50 = vadd.f32 %v5586_v61, %v2253_v21 }
 0x13b   : > { %2700 = vmatpush.bf16.msrb.mxu3 %v4074_v10  ;;  %v2756_v61 = vperm.slane %v5632_v60, 0 }
 0x13c   : > { %2644 = vmatpush.bf16.msrb.mxu0 %v3874_v59  ;;  %v2269_v38 = vadd.f32 %v5558_v52, %v2250_v2  ;;  %v2311_v54 = vpop.f32.mrf.mxu2  ;;  %v2291_v48 = vadd.f32 %v5588_v8, %v2272_v50 }
 0x13d   : > { %2663 = vmatpush.bf16.msrb.mxu1 %v3938_v39 }
 0x13e   : > { %2682 = vmatpush.bf16.msrb.mxu2 %v4002_v27  ;;  %v2288_v57 = vadd.f32 %v5560_v56, %v2269_v38  ;;  %v2310_v7 = vadd.f32 %v2309_v33, %v2291_v48 }
 0x13f   : > { %2701 = vmatpush.bf16.msrb.mxu3 %v4066_v40  ;;  %v2330_v43 = vpop.f32.mrf.mxu3 }
 0x140   : > { %v2361_v1 = vpop.f32.mrf.mxu1  ;;  %2664 = vmatmul.bf16.vlgmr.msrb.gmra.mxu1 %v5257_v18  ;;  %v2307_v52 = vadd.f32 %v5578_v41, %v2288_v57  ;;  %v2236_v18 = vadd.f32 %v5523_v44, %v2217_v29  ;;  %v2329_v20 = vadd.f32 %v2328_v23, %v2310_v7 }
 0x141   : > { %2645 = vmatmul.bf16.vlgmr.msrb.gmra.mxu0 %v5255_v17 }
 0x142   : > { %v2342_v16 = vpop.f32.mrf.mxu0  ;;  %2702 = vmatmul.bf16.vlgmr.msrb.gmra.mxu3 %v5264_v25  ;;  %v2326_v3 = vadd.f32 %v5580_v28, %v2307_v52  ;;  %v2255_v4 = vadd.f32 %v5525_v51, %v2236_v18 }
 0x143   : > { %v2343_v42 = vadd.f32 %v2342_v16, %v2324_v49  ;;  %2683 = vmatmul.bf16.vlgmr.msrb.gmra.mxu2 %v5262_v22  ;;  %v2742_v22 = vperm.slane %v5627_v14, 0 }
 0x144   : > { %v2380_v56 = vpop.f32.mrf.mxu2  ;;  %v2274_v10 = vadd.f32 %v2273_v36, %v2255_v4 }
 0x145   : > { %v2362_v11 = vadd.f32 %v2361_v1, %v2343_v42 }
 0x146   : > { %v2293_v8 = vadd.f32 %v2292_v45, %v2274_v10 }
 0x147   : > { %v2399_v17 = vpop.f32.mrf.mxu3  ;;  %v2381_v41 = vadd.f32 %v2380_v56, %v2362_v11 }
 0x148   : > { %v2363_v13 = vpop.f32.mrf.mxu1  ;;  %v2312_v27 = vadd.f32 %v2311_v54, %v2293_v8 }
 0x149   : > { %v2400_v12 = vadd.f32 %v2399_v17, %v2381_v41 }
 0x14a   : > { %v2344_v25 = vpop.f32.mrf.mxu0  ;;  %v2331_v23 = vadd.f32 %v2330_v43, %v2312_v27 }
 0x14b   : > { %v2345_v53 = vadd.f32 %v2344_v25, %v2326_v3  ;;  %v2746_v30 = vmul.f32 %v2742_v22, %v2400_v12 }
 0x14c   : > { %v2382_v28 = vpop.f32.mrf.mxu2 }
 0x14d   : > { %v2760_v44 = vadd.f32 %v2756_v61, %v2746_v30  ;;  %v2364_v0 = vadd.f32 %v2363_v13, %v2345_v53 }
 0x14f   : > { %v2401_v15 = vpop.f32.mrf.mxu3  ;;  %v2768_v19 = vmax.f32 %v2760_v44, 0.0  ;;  %v2383_v34 = vadd.f32 %v2382_v28, %v2364_v0 }
 0x150   : > { %v2366_v5 = vpop.f32.mrf.mxu1  ;;  %2669 = vmatmul.bf16.gmra.mxu1 %v5301_v58 }
 0x151   : > { %2776 = vst [vmem:[%s5641_s24] sm:$0xff] %v2768_v19  ;;  %v2402_v31 = vadd.f32 %v2401_v15, %v2383_v34  ;;  %2650 = vmatmul.bf16.gmra.mxu0 %v5299_v55 }
 0x152   : > { %v2347_v26 = vpop.f32.mrf.mxu0  ;;  %2707 = vmatmul.bf16.gmra.mxu3 %v5308_v63 }
 0x153   : > { %v2348_v51 = vadd.f32 %v2347_v26, %v2329_v20  ;;  %v2748_v59 = vmul.f32 %v2742_v22, %v2402_v31  ;;  %2688 = vmatmul.bf16.gmra.mxu2 %v5306_v62 }
 0x155   : > { %v2762_v32 = vadd.f32 %v2756_v61, %v2748_v59  ;;  %v2367_v39 = vadd.f32 %v2366_v5, %v2348_v51 }
 0x156   : > { %v2385_v40 = vpop.f32.mrf.mxu2 }
 0x157   : > { %v2404_v33 = vpop.f32.mrf.mxu3  ;;  %v2770_v6 = vmax.f32 %v2762_v32, 0.0  ;;  %v2386_v36 = vadd.f32 %v2385_v40, %v2367_v39 }
 0x158   : > { %v2368_v46 = vpop.f32.mrf.mxu1 }
 0x159   : > { %2778 = vst [vmem:[%s5641_s24 + $0x10] sm:$0xff] %v2770_v6  ;;  %v2405_v55 = vadd.f32 %v2404_v33, %v2386_v36 }
 0x15a   : > { %v2349_v45 = vpop.f32.mrf.mxu0 }
 0x15b   : > { %v2350_v35 = vadd.f32 %v2349_v45, %v2331_v23  ;;  %v2750_v58 = vmul.f32 %v2742_v22, %v2405_v55 }
 0x15d   : > { %v2764_v2 = vadd.f32 %v2756_v61, %v2750_v58  ;;  %v2369_v24 = vadd.f32 %v2368_v46, %v2350_v35 }
 0x15e   : > { %v2387_v37 = vpop.f32.mrf.mxu2 }
 0x15f   : > { %v2406_v62 = vpop.f32.mrf.mxu3  ;;  %v2772_v38 = vmax.f32 %v2764_v2, 0.0  ;;  %v2388_v63 = vadd.f32 %v2387_v37, %v2369_v24 }
 0x160   : > { %v2437_v47 = vpop.f32.mrf.mxu1 }
 0x161   : > { %2780 = vst [vmem:[%s5641_s24 + $0x20] sm:$0xff] %v2772_v38  ;;  %v2407_v43 = vadd.f32 %v2406_v62, %v2388_v63 }
 0x162   : > { %v2418_v54 = vpop.f32.mrf.mxu0 }
 0x163   : > { %v2438_v49 = vadd.f32 %v2437_v47, %v2418_v54  ;;  %v2752_v16 = vmul.f32 %v2742_v22, %v2407_v43 }
 0x165   : > { %v2766_v1 = vadd.f32 %v2756_v61, %v2752_v16 }
 0x166   : > { %v2456_v9 = vpop.f32.mrf.mxu2 }
 0x167   : > { %v2475_v57 = vpop.f32.mrf.mxu3  ;;  %v2774_v42 = vmax.f32 %v2766_v1, 0.0  ;;  %v2457_v21 = vadd.f32 %v2456_v9, %v2438_v49 }
 0x168   : > { %v2439_v29 = vpop.f32.mrf.mxu1 }
 0x169   : > { %2782 = vst [vmem:[%s5641_s24 + $0x30] sm:$0xff] %v2774_v42  ;;  %v2476_v11 = vadd.f32 %v2475_v57, %v2457_v21 }
 0x16a   : > { %v2420_v52 = vpop.f32.mrf.mxu0 }
 0x16b   : > { %v2440_v50 = vadd.f32 %v2439_v29, %v2420_v52 }
 0x16e   : > { %v2458_v56 = vpop.f32.mrf.mxu2 }
 0x16f   : > { %v2477_v17 = vpop.f32.mrf.mxu3  ;;  %v2459_v18 = vadd.f32 %v2458_v56, %v2440_v50 }
 0x170   : > { %v2442_v41 = vpop.f32.mrf.mxu1 }
 0x171   : > { %v2478_v13 = vadd.f32 %v2477_v17, %v2459_v18 }
 0x172   : > { %v2423_v3 = vpop.f32.mrf.mxu0 }
 0x173   : > { %v2443_v25 = vadd.f32 %v2442_v41, %v2423_v3 }
 0x176   : > { %v2461_v48 = vpop.f32.mrf.mxu2 }
 0x177   : > { %v2480_v12 = vpop.f32.mrf.mxu3  ;;  %v2462_v22 = vadd.f32 %v2461_v48, %v2443_v25 }
 0x178   : > { %v2444_v53 = vpop.f32.mrf.mxu1 }
 0x179   : > { %v2481_v7 = vadd.f32 %v2480_v12, %v2462_v22 }
 0x17a   : > { %v2425_v61 = vpop.f32.mrf.mxu0 }
 0x17b   : > { %v2445_v4 = vadd.f32 %v2444_v53, %v2425_v61 }
 0x17e   : > { %v2463_v30 = vpop.f32.mrf.mxu2 }
 0x17f   : > { %v2482_v10 = vpop.f32.mrf.mxu3  ;;  %v2464_v44 = vadd.f32 %v2463_v30, %v2445_v4 }
 0x180   : > { %v2513_v28 = vpop.f32.mrf.mxu1 }
 0x181   : > { %v2483_v15 = vadd.f32 %v2482_v10, %v2464_v44 }
 0x182   : > { %v2494_v0 = vpop.f32.mrf.mxu0 }
 0x183   : > { %v2495_v35 = vadd.f32 %v2494_v0, %v2476_v11 }
 0x185   : > { %v2514_v58 = vadd.f32 %v2513_v28, %v2495_v35 }
 0x186   : > { %v2532_v20 = vpop.f32.mrf.mxu2 }
 0x187   : > { %v2551_v19 = vpop.f32.mrf.mxu3  ;;  %v2533_v37 = vadd.f32 %v2532_v20, %v2514_v58  ;;  %v2743_v20 = vperm.slane %v5627_v14, 1 }
 0x188   : > { %v2515_v26 = vpop.f32.mrf.mxu1 }
 0x189   : > { %v2552_v54 = vadd.f32 %v2551_v19, %v2533_v37 }
 0x18a   : > { %v2496_v34 = vpop.f32.mrf.mxu0 }
 0x18b   : > { %v2497_v63 = vadd.f32 %v2496_v34, %v2478_v13 }
 0x18d   : > { %v2516_v47 = vadd.f32 %v2515_v26, %v2497_v63 }
 0x18e   : > { %v2534_v5 = vpop.f32.mrf.mxu2 }
 0x18f   : > { %v2553_v8 = vpop.f32.mrf.mxu3  ;;  %v2535_v1 = vadd.f32 %v2534_v5, %v2516_v47 }
 0x190   : > { %v2518_v51 = vpop.f32.mrf.mxu1 }
 0x191   : > { %v2554_v52 = vadd.f32 %v2553_v8, %v2535_v1 }
 0x192   : > { %v2499_v31 = vpop.f32.mrf.mxu0 }
 0x193   : > { %v2500_v42 = vadd.f32 %v2499_v31, %v2481_v7 }
 0x195   : > { %v2519_v50 = vadd.f32 %v2518_v51, %v2500_v42 }
 0x196   : > { %v2537_v27 = vpop.f32.mrf.mxu2 }
 0x197   : > { %v2556_v59 = vpop.f32.mrf.mxu3  ;;  %v2538_v18 = vadd.f32 %v2537_v27, %v2519_v50 }
 0x198   : > { %v2520_v39 = vpop.f32.mrf.mxu1 }
 0x199   : > { %v2557_v22 = vadd.f32 %v2556_v59, %v2538_v18 }
 0x19a   : > { %v2501_v32 = vpop.f32.mrf.mxu0 }
 0x19b   : > { %v2502_v13 = vadd.f32 %v2501_v32, %v2483_v15  ;;  %v2757_v15 = vperm.slane %v5632_v60, 1 }
 0x19d   : > { %v2521_v53 = vadd.f32 %v2520_v39, %v2502_v13 }
 0x19e   : > { %v2539_v40 = vpop.f32.mrf.mxu2 }
 0x19f   : > { %v2558_v33 = vpop.f32.mrf.mxu3  ;;  %v2540_v44 = vadd.f32 %v2539_v40, %v2521_v53 }
 0x1a0   : > { %v2589_v6 = vpop.f32.mrf.mxu1 }
 0x1a1   : > { %v2559_v31 = vadd.f32 %v2558_v33, %v2540_v44 }
 0x1a2   : > { %v2570_v23 = vpop.f32.mrf.mxu0 }
 0x1a3   : > { %v2571_v49 = vadd.f32 %v2570_v23, %v2552_v54 }
 0x1a5   : > { %v2590_v21 = vadd.f32 %v2589_v6, %v2571_v49 }
 0x1a6   : > { %v2608_v36 = vpop.f32.mrf.mxu2 }
 0x1a7   : > { %v2627_v45 = vpop.f32.mrf.mxu3  ;;  %v2609_v29 = vadd.f32 %v2608_v36, %v2590_v21 }
 0x1a8   : > { %v2591_v55 = vpop.f32.mrf.mxu1 }
 0x1a9   : > { %v2628_v3 = vadd.f32 %v2627_v45, %v2609_v29 }
 0x1aa   : > { %v2572_v46 = vpop.f32.mrf.mxu0 }
 0x1ab   : > { %v2573_v11 = vadd.f32 %v2572_v46, %v2554_v52 }
 0x1ad   : > { %v2592_v48 = vadd.f32 %v2591_v55, %v2573_v11 }
 0x1ae   : > { %v2610_v2 = vpop.f32.mrf.mxu2 }
 0x1af   : > { %v2629_v24 = vpop.f32.mrf.mxu3  ;;  %v2611_v61 = vadd.f32 %v2610_v2, %v2592_v48 }
 0x1b0   : > { %v2594_v38 = vpop.f32.mrf.mxu1 }
 0x1b1   : > { %v2630_v0 = vadd.f32 %v2629_v24, %v2611_v61 }
 0x1b2   : > { %v2575_v62 = vpop.f32.mrf.mxu0 }
 0x1b3   : > { %v2576_v4 = vadd.f32 %v2575_v62, %v2557_v22 }
 0x1b5   : > { %v2595_v26 = vadd.f32 %v2594_v38, %v2576_v4 }
 0x1b6   : > { %v2613_v43 = vpop.f32.mrf.mxu2 }
 0x1b7   : > { %v2632_v16 = vpop.f32.mrf.mxu3  ;;  %v2614_v51 = vadd.f32 %v2613_v43, %v2595_v26 }
 0x1b8   : > { %v2596_v57 = vpop.f32.mrf.mxu1 }
 0x1b9   : > { %v2633_v6 = vadd.f32 %v2632_v16, %v2614_v51 }
 0x1ba   : > { %v2577_v9 = vpop.f32.mrf.mxu0 }
 0x1bb   : > { %v2578_v59 = vadd.f32 %v2577_v9, %v2559_v31 }
 0x1bd   : > { %v2597_v46 = vadd.f32 %v2596_v57, %v2578_v59 }
 0x1be   : > { %v2615_v56 = vpop.f32.mrf.mxu2 }
 0x1bf   : > { %v2634_v17 = vpop.f32.mrf.mxu3  ;;  %v2616_v60 = vadd.f32 %v2615_v56, %v2597_v46 }
 0x1c0   : > { %v2665_v25 = vpop.f32.mrf.mxu1 }
 0x1c1   : > { %v2635_v38 = vadd.f32 %v2634_v17, %v2616_v60 }
 0x1c2   : > { %v2646_v41 = vpop.f32.mrf.mxu0 }
 0x1c3   : > { %v2647_v12 = vadd.f32 %v2646_v41, %v2628_v3 }
 0x1c5   : > { %v2666_v30 = vadd.f32 %v2665_v25, %v2647_v12 }
 0x1c6   : > { %v2684_v7 = vpop.f32.mrf.mxu2 }
 0x1c7   : > { %v2703_v10 = vpop.f32.mrf.mxu3  ;;  %v2685_v28 = vadd.f32 %v2684_v7, %v2666_v30 }
 0x1c8   : > { %v2667_v34 = vpop.f32.mrf.mxu1 }
 0x1c9   : > { %v2704_v5 = vadd.f32 %v2703_v10, %v2685_v28 }
 0x1ca   : > { %v2648_v19 = vpop.f32.mrf.mxu0 }
 0x1cb   : > { %v2649_v8 = vadd.f32 %v2648_v19, %v2630_v0  ;;  %v2747_v27 = vmul.f32 %v2743_v20, %v2704_v5 }
 0x1cd   : > { %v2761_v32 = vadd.f32 %v2757_v15, %v2747_v27  ;;  %v2668_v39 = vadd.f32 %v2667_v34, %v2649_v8 }
 0x1ce   : > { %v2686_v23 = vpop.f32.mrf.mxu2 }
 0x1cf   : > { %v2705_v40 = vpop.f32.mrf.mxu3  ;;  %v2769_v36 = vmax.f32 %v2761_v32, 0.0  ;;  %v2687_v45 = vadd.f32 %v2686_v23, %v2668_v39 }
 0x1d0   : > { %v2670_v58 = vpop.f32.mrf.mxu1 }
 0x1d1   : > { %2777 = vst [vmem:[%s5641_s24 + $0x8] sm:$0xff] %v2769_v36  ;;  %v2706_v55 = vadd.f32 %v2705_v40, %v2687_v45 }
 0x1d2   : > { %v2651_v14 = vpop.f32.mrf.mxu0 }
 0x1d3   : > { %v2652_v35 = vadd.f32 %v2651_v14, %v2633_v6  ;;  %v2749_v2 = vmul.f32 %v2743_v20, %v2706_v55 }
 0x1d5   : > { %v2763_v33 = vadd.f32 %v2757_v15, %v2749_v2  ;;  %v2671_v24 = vadd.f32 %v2670_v58, %v2652_v35 }
 0x1d6   : > { %v2689_v37 = vpop.f32.mrf.mxu2 }
 0x1d7   : > { %v2708_v62 = vpop.f32.mrf.mxu3  ;;  %v2771_v63 = vmax.f32 %v2763_v33, 0.0  ;;  %v2690_v54 = vadd.f32 %v2689_v37, %v2671_v24 }
 0x1d8   : > { %v2672_v1 = vpop.f32.mrf.mxu1 }
 0x1d9   : > { %2779 = vst [vmem:[%s5641_s24 + $0x18] sm:$0xff] %v2771_v63  ;;  %v2709_v49 = vadd.f32 %v2708_v62, %v2690_v54 }
 0x1da   : > { %v2653_v47 = vpop.f32.mrf.mxu0 }
 0x1db   : > { %v2654_v43 = vadd.f32 %v2653_v47, %v2635_v38  ;;  %v2751_v16 = vmul.f32 %v2743_v20, %v2709_v49 }
 0x1dd   : > { %v2765_v9 = vadd.f32 %v2757_v15, %v2751_v16  ;;  %v2673_v57 = vadd.f32 %v2672_v1, %v2654_v43 }
 0x1de   : > { %v2691_v42 = vpop.f32.mrf.mxu2 }
 0x1df   : > { %v2773_v21 = vmax.f32 %v2765_v9, 0.0  ;;  %v2692_v52 = vadd.f32 %v2691_v42, %v2673_v57  ;;  %v2710_v29 = vpop.f32.mrf.mxu3 }
 0x1e1   : > { %2781 = vst [vmem:[%s5641_s24 + $0x28] sm:$0xff] %v2773_v21  ;;  %v2711_v50 = vadd.f32 %v2710_v29, %v2692_v52 }
 0x1e3   : > { %v2753_v11 = vmul.f32 %v2743_v20, %v2711_v50 }
 0x1e5   : > { %v2767_v56 = vadd.f32 %v2757_v15, %v2753_v11 }
 0x1e7   : > { %v2775_v17 = vmax.f32 %v2767_v56, 0.0 }
 0x1e9   : > { %2783 = vst [vmem:[%s5641_s24 + $0x38] sm:$0xff] %v2775_v17 }
 0x1ea   : > { %4656 = shalt.err (!%p4653_p11)
}
 0x1eb   : > { %s4727_s1 = smov 256   ;;  %s4728_s19 = smov 1024  }
 0x1ec   : > { %s4729_s21 = smov 16  }
 0x1ed   : > { %4428 = dma.vmem_to_hbm [thread:$0]  (%p4845_p13), %s2801_s9, 1024, %s2803_s12, %s2785_s18, %s4727_s1, %s4728_s19, %s4729_s21  }
 0x1ee PF: > { %p4451_p12 = scmp.ge.s32.totalorder %s4719_s20, 2  ;;  %s2817_s17 = sand.u32 1, %s4699_s15  }
 0x1ef   : > { %s2818_s28 = scalar_lea.sflag [#allocation5], %s2817_s17 }
 0x1f0   : > { %p4445_p2 = pnand %p4451_p12, %p4849_p0 }
 0x1f2   : > { %p4446_p3 = pneg %p4445_p2 }
 0x1f4   : > { %4694 = dma.done.wait (%p4446_p3), %s2818_s28, 1024  }
 0x1f5   : > { %4696 = vsyncadd (%p4446_p3), %s2818_s28, 4294966272  ;;  %s24_s20 = sadd.s32 1, %s4719_s20   ;;  %s5720_s10 = sld [smem:[#allocation16_spill]] }
 0x1f6   : > { %p21_p1 = scmp.ge.s32.totalorder %s24_s20, 6   ;;  %s5721_s17 = sld [smem:[#allocation19_spill]] }
 0x1f7   : > { %s5722_s18 = sld [smem:[#allocation17_spill]]  ;;  %s5724_s15 = smov %s4703_s16 }
 0x1f8   : > { %s5723_s19 = sld [smem:[#allocation18_spill]]  ;;  %23 = sbr.rel (!%p21_p1) target bundleno = 12 (0xc), region = 119 }
 0x1fb   : > { %s5725_s16 = smov %s5720_s10 }
 0x1fd   :  { %2824 = vsyncpa [#allocation4], 1 }
 0x1fe   :  { %2826 = vsyncpa [#allocation4 + $0x1], 1 }
 0x1ff   :  { %2827 = vsyncpa [#allocation7], 1 }
 0x200   :  { %2829 = vsyncpa [#allocation7 + $0x1], 1 }
 0x201   :  { %2830 = vsyncpa [#allocation10], 1 }
 0x202   :  { %2832 = vsyncpa [#allocation10 + $0x1], 1 }
 0x203   :  { %2833 = vsyncpa [#allocation5], 1 }
 0x204   :  { %2835 = vsyncpa [#allocation5 + $0x1], 1 }

</bundles_post_ra>
